<compile_context>
chip_gen: v6e
topology: v6e:2x2x1
jax: 0.10.0
libtpu: 0.0.40
codegen_flags: <defaults>
</compile_context>

<pallas_src>
import functools

import jax
import jax.numpy as jnp
from jax import lax
from jax.experimental import pallas as pl
from jax.experimental.pallas import tpu as pltpu  # noqa: F401  (TPU backend)

D_MODEL = 32
N_HEADS = 4
HEAD_DIM = D_MODEL // N_HEADS
DIM_FF = 64
EPS = 1e-6           # layer_norm_eps
D_PAD = 128          # lane-dense padding of d_model


def _layer_norm_padded(x, w, b):
    """LayerNorm over the first D_MODEL features of a lane-padded (R, D_PAD) slab.

    Padded lanes of `x`, `w`, `b` are zero, so sums divided by the true D_MODEL
    give exact statistics and the padded lanes of the result remain zero.
    PyTorch LayerNorm uses biased variance.
    """
    inv_d = 1.0 / D_MODEL
    mean = jnp.sum(x, axis=-1, keepdims=True) * inv_d
    ex2 = jnp.sum(x * x, axis=-1, keepdims=True) * inv_d
    var = ex2 - mean * mean
    return (x - mean) * lax.rsqrt(var + EPS) * w + b


def encoder_layer_kernel(
    x_ref,
    ln1_w_ref, ln1_b_ref,
    wqkv_ref, bqkv_ref,
    wo_ref, bo_ref,
    ln2_w_ref, ln2_b_ref,
    w1_ref, b1_ref, w2_ref, b2_ref,
    out_ref,
    *, batch, seq_len,
):
    f32 = jnp.float32
    x = x_ref[...]                                   # (B*S, D_PAD); lanes >= D_MODEL are 0

    # Hoist all parameter loads / broadcasts out of the loops.
    ln1_w, ln1_b = ln1_w_ref[...], ln1_b_ref[...]
    wqkv, bqkv = wqkv_ref[...], bqkv_ref[...]
    wo, bo = wo_ref[...], bo_ref[...]
    ln2_w, ln2_b = ln2_w_ref[...], ln2_b_ref[...]
    w1, b1 = w1_ref[...], b1_ref[...]
    w2, b2 = w2_ref[...], b2_ref[...]

    # ---- multi-head attention sub-layer (pre-norm) ----
    xn = _layer_norm_padded(x, ln1_w, ln1_b)                         # (B*S, D_PAD)
    qkv = jnp.dot(xn, wqkv, preferred_element_type=f32) + bqkv       # (B*S, 3*D_MODEL)

    # NOTE: reference module scales scores by 1/sqrt(d_model), NOT sqrt(head_dim).
    inv_scale = 1.0 / jnp.sqrt(f32(D_MODEL))

    att_blocks = []
    for b in range(batch):                     # static unroll; rows are sublane-aligned
        r0 = b * seq_len
        att_b = None
        for h in range(N_HEADS):               # static unroll over heads
            lo = h * HEAD_DIM
            qh = qkv[r0:r0 + seq_len, lo:lo + HEAD_DIM]                        # (S, hd)
            kh = qkv[r0:r0 + seq_len, D_MODEL + lo:D_MODEL + lo + HEAD_DIM]    # (S, hd)
            vh = qkv[r0:r0 + seq_len, 2 * D_MODEL + lo:2 * D_MODEL + lo + HEAD_DIM]
            # scores = q @ k^T without an explicit transpose (contract last dims).
            s = lax.dot_general(qh, kh, (((1,), (1,)), ((), ())),
                                preferred_element_type=f32) * inv_scale
            s = s - jnp.max(s, axis=-1, keepdims=True)
            p = jnp.exp(s)
            p = p * pl.reciprocal(jnp.sum(p, axis=-1, keepdims=True), approx=True)
            ctx = jnp.dot(p, vh, preferred_element_type=f32)                   # (S, hd)
            # attn_out accumulation: ctx_h @ wo[h*hd:(h+1)*hd, :]; the weight row
            # slice is sublane-tile aligned, no lane-axis head concat required.
            contrib = jnp.dot(ctx, wo[lo:lo + HEAD_DIM, :],
                              preferred_element_type=f32)                      # (S, D_PAD)
            att_b = contrib if att_b is None else att_b + contrib
        att_blocks.append(att_b)
    attn_out = jnp.concatenate(att_blocks, axis=0) + bo              # (B*S, D_PAD)
    h1 = x + attn_out                                                # mha_dropout = identity

    # ---- feed-forward sub-layer (pre-norm) ----
    hn = _layer_norm_padded(h1, ln2_w, ln2_b)
    f = jnp.dot(hn, w1, preferred_element_type=f32) + b1             # (B*S, DIM_FF)
    f = jnp.maximum(f, 0.0)                                          # relu
    f = jnp.dot(f, w2, preferred_element_type=f32) + b2              # (B*S, D_PAD)

    out_ref[...] = (h1 + f).astype(out_ref.dtype)                    # lane-dense store


def _pad_cols(a, width):
    return jnp.pad(a, ((0, 0), (0, width - a.shape[1])))


def _pad_rows(a, height):
    return jnp.pad(a, ((0, height - a.shape[0]), (0, 0)))


def transformer_encoder_layer(x, params):
    B, S, D = x.shape
    assert D == D_MODEL

    # Wrapper-side fusion + lane padding (static XLA ops, done once).
    wqkv = jnp.concatenate([params["wq"], params["wk"], params["wv"]], axis=1)  # (D, 3D)
    wqkv = _pad_rows(wqkv, D_PAD)                                               # (D_PAD, 3D)
    bqkv = jnp.concatenate([params["bq"], params["bk"], params["bv"]], axis=1)  # (1, 3D)

    weights = [
        _pad_cols(params["ln1_w"], D_PAD), _pad_cols(params["ln1_b"], D_PAD),
        wqkv, bqkv,
        _pad_cols(params["wo"], D_PAD), _pad_cols(params["bo"], D_PAD),
        _pad_cols(params["ln2_w"], D_PAD), _pad_cols(params["ln2_b"], D_PAD),
        _pad_rows(params["w1"], D_PAD), params["b1"],
        _pad_cols(params["w2"], D_PAD), _pad_cols(params["b2"], D_PAD),
    ]

    x2 = _pad_cols(x.reshape(B * S, D), D_PAD)                                  # (B*S, D_PAD)

    flops = (2 * B * S * D * 3 * D                       # fused QKV projection
             + B * N_HEADS * 2 * (2 * S * S * HEAD_DIM)  # scores + context matmuls
             + 2 * B * S * D * D                         # output projection
             + 2 * 2 * B * S * D * DIM_FF)               # two FFN matmuls
    transcendentals = B * N_HEADS * S * S + 4 * B * S    # exp + rsqrt + reciprocal
    bytes_accessed = 4 * (x2.size + sum(int(w.size) for w in weights) + B * S * D_PAD)

    out = pl.pallas_call(
        functools.partial(encoder_layer_kernel, batch=B, seq_len=S),
        out_shape=jax.ShapeDtypeStruct((B * S, D_PAD), x.dtype),
        cost_estimate=pl.CostEstimate(flops=flops,
                                      transcendentals=transcendentals,
                                      bytes_accessed=bytes_accessed),
    )(x2, *weights)

    return out[:, :D].reshape(B, S, D)


def init_params(key):
    ks = jax.random.split(key, 8)
    scale = 0.05
    return {
        "ln1_w": jnp.ones((1, D_MODEL), jnp.float32),
        "ln1_b": jnp.zeros((1, D_MODEL), jnp.float32),
        "wq": scale * jax.random.normal(ks[0], (D_MODEL, D_MODEL), jnp.float32),
        "bq": scale * jax.random.normal(ks[1], (1, D_MODEL), jnp.float32),
        "wk": scale * jax.random.normal(ks[2], (D_MODEL, D_MODEL), jnp.float32),
        "bk": jnp.zeros((1, D_MODEL), jnp.float32),
        "wv": scale * jax.random.normal(ks[3], (D_MODEL, D_MODEL), jnp.float32),
        "bv": jnp.zeros((1, D_MODEL), jnp.float32),
        "wo": scale * jax.random.normal(ks[4], (D_MODEL, D_MODEL), jnp.float32),
        "bo": jnp.zeros((1, D_MODEL), jnp.float32),
        "ln2_w": jnp.ones((1, D_MODEL), jnp.float32),
        "ln2_b": jnp.zeros((1, D_MODEL), jnp.float32),
        "w1": scale * jax.random.normal(ks[5], (D_MODEL, DIM_FF), jnp.float32),
        "b1": scale * jax.random.normal(ks[6], (1, DIM_FF), jnp.float32),
        "w2": scale * jax.random.normal(ks[7], (DIM_FF, D_MODEL), jnp.float32),
        "b2": jnp.zeros((1, D_MODEL), jnp.float32),
    }


def reference(x, p):
    # Pure-JAX mirror of the PyTorch forward (eval mode, e_mask=None).
    def ln(t, w, b):
        m = t.mean(-1, keepdims=True)
        v = jnp.square(t - m).mean(-1, keepdims=True)
        return (t - m) / jnp.sqrt(v + EPS) * w + b

    B, S, D = x.shape
    xn = ln(x, p["ln1_w"], p["ln1_b"])
    q = xn @ p["wq"] + p["bq"]
    k = xn @ p["wk"] + p["bk"]
    v = xn @ p["wv"] + p["bv"]
    qh = q.reshape(B, S, N_HEADS, HEAD_DIM).transpose(0, 2, 1, 3)
    kh = k.reshape(B, S, N_HEADS, HEAD_DIM).transpose(0, 2, 1, 3)
    vh = v.reshape(B, S, N_HEADS, HEAD_DIM).transpose(0, 2, 1, 3)
    scores = (qh @ kh.transpose(0, 1, 3, 2)) / jnp.sqrt(jnp.float32(D_MODEL))
    pattn = jax.nn.softmax(scores, axis=-1)
    ctx = (pattn @ vh).transpose(0, 2, 1, 3).reshape(B, S, D)
    attn_out = ctx @ p["wo"] + p["bo"]
    h1 = x + attn_out
    hn = ln(h1, p["ln2_w"], p["ln2_b"])
    f = jnp.maximum(hn @ p["w1"] + p["b1"], 0.0)
    f = f @ p["w2"] + p["b2"]
    return h1 + f


if __name__ == "__main__":
    key = jax.random.PRNGKey(0)
    kx, kp = jax.random.split(key)
    B, S = 2, 8
    x = jax.random.normal(kx, (B, S, D_MODEL), jnp.float32)
    params = init_params(kp)

    out = transformer_encoder_layer(x, params)
    out = jax.block_until_ready(out)

    ref = reference(x, params)
    assert out.shape == (B, S, D_MODEL)
    # Tolerance loosened slightly vs exact f32 because the softmax denominator
    # uses the hardware approximate reciprocal (pl.reciprocal(approx=True)).
    assert jnp.allclose(out, ref, atol=1e-3, rtol=1e-3), float(jnp.max(jnp.abs(out - ref)))
    print("KERNEL_OK")
</pallas_src>

<mosaic_0001>
module attributes {stable_mosaic.version = 11 : i64} {
  func.func @encoder_layer_kernel(%arg0: memref<16x128xf32, #tpu.memory_space<vmem>>, %arg1: memref<1x128xf32, #tpu.memory_space<vmem>>, %arg2: memref<1x128xf32, #tpu.memory_space<vmem>>, %arg3: memref<128x96xf32, #tpu.memory_space<vmem>>, %arg4: memref<1x96xf32, #tpu.memory_space<vmem>>, %arg5: memref<32x128xf32, #tpu.memory_space<vmem>>, %arg6: memref<1x128xf32, #tpu.memory_space<vmem>>, %arg7: memref<1x128xf32, #tpu.memory_space<vmem>>, %arg8: memref<1x128xf32, #tpu.memory_space<vmem>>, %arg9: memref<128x64xf32, #tpu.memory_space<vmem>>, %arg10: memref<1x64xf32, #tpu.memory_space<vmem>>, %arg11: memref<64x128xf32, #tpu.memory_space<vmem>>, %arg12: memref<1x128xf32, #tpu.memory_space<vmem>>, %arg13: memref<16x128xf32, #tpu.memory_space<vmem>>) attributes {dimension_semantics = [], scalar_prefetch = 0 : i64, scratch_operands = 0 : i64, tpu.core_type = #tpu.core_type<tc>} {
    %c0 = arith.constant 0 : index
    %c0_0 = arith.constant 0 : index
    %0 = vector.load %arg0[%c0, %c0_0] : memref<16x128xf32, #tpu.memory_space<vmem>>, vector<16x128xf32>
    %c0_1 = arith.constant 0 : index
    %c0_2 = arith.constant 0 : index
    %1 = vector.load %arg1[%c0_1, %c0_2] : memref<1x128xf32, #tpu.memory_space<vmem>>, vector<1x128xf32>
    %c0_3 = arith.constant 0 : index
    %c0_4 = arith.constant 0 : index
    %2 = vector.load %arg2[%c0_3, %c0_4] : memref<1x128xf32, #tpu.memory_space<vmem>>, vector<1x128xf32>
    %c0_5 = arith.constant 0 : index
    %c0_6 = arith.constant 0 : index
    %3 = vector.load %arg3[%c0_5, %c0_6] : memref<128x96xf32, #tpu.memory_space<vmem>>, vector<128x96xf32>
    %c0_7 = arith.constant 0 : index
    %c0_8 = arith.constant 0 : index
    %4 = vector.load %arg4[%c0_7, %c0_8] : memref<1x96xf32, #tpu.memory_space<vmem>>, vector<1x96xf32>
    %c0_9 = arith.constant 0 : index
    %c0_10 = arith.constant 0 : index
    %5 = vector.load %arg5[%c0_9, %c0_10] : memref<32x128xf32, #tpu.memory_space<vmem>>, vector<32x128xf32>
    %c0_11 = arith.constant 0 : index
    %c0_12 = arith.constant 0 : index
    %6 = vector.load %arg6[%c0_11, %c0_12] : memref<1x128xf32, #tpu.memory_space<vmem>>, vector<1x128xf32>
    %c0_13 = arith.constant 0 : index
    %c0_14 = arith.constant 0 : index
    %7 = vector.load %arg7[%c0_13, %c0_14] : memref<1x128xf32, #tpu.memory_space<vmem>>, vector<1x128xf32>
    %c0_15 = arith.constant 0 : index
    %c0_16 = arith.constant 0 : index
    %8 = vector.load %arg8[%c0_15, %c0_16] : memref<1x128xf32, #tpu.memory_space<vmem>>, vector<1x128xf32>
    %c0_17 = arith.constant 0 : index
    %c0_18 = arith.constant 0 : index
    %9 = vector.load %arg9[%c0_17, %c0_18] : memref<128x64xf32, #tpu.memory_space<vmem>>, vector<128x64xf32>
    %c0_19 = arith.constant 0 : index
    %c0_20 = arith.constant 0 : index
    %10 = vector.load %arg10[%c0_19, %c0_20] : memref<1x64xf32, #tpu.memory_space<vmem>>, vector<1x64xf32>
    %c0_21 = arith.constant 0 : index
    %c0_22 = arith.constant 0 : index
    %11 = vector.load %arg11[%c0_21, %c0_22] : memref<64x128xf32, #tpu.memory_space<vmem>>, vector<64x128xf32>
    %c0_23 = arith.constant 0 : index
    %c0_24 = arith.constant 0 : index
    %12 = vector.load %arg12[%c0_23, %c0_24] : memref<1x128xf32, #tpu.memory_space<vmem>>, vector<1x128xf32>
    %cst = arith.constant dense<0.000000e+00> : vector<16xf32>
    %13 = vector.multi_reduction <add>, %0, %cst [1] : vector<16x128xf32> to vector<16xf32>
    %14 = vector.shape_cast %13 : vector<16xf32> to vector<16x1xf32>
    %cst_25 = arith.constant 3.125000e-02 : f32
    %15 = vector.broadcast %cst_25 : f32 to vector<16x1xf32>
    %16 = arith.mulf %14, %15 : vector<16x1xf32>
    %17 = arith.mulf %0, %0 : vector<16x128xf32>
    %cst_26 = arith.constant dense<0.000000e+00> : vector<16xf32>
    %18 = vector.multi_reduction <add>, %17, %cst_26 [1] : vector<16x128xf32> to vector<16xf32>
    %19 = vector.shape_cast %18 : vector<16xf32> to vector<16x1xf32>
    %cst_27 = arith.constant 3.125000e-02 : f32
    %20 = vector.broadcast %cst_27 : f32 to vector<16x1xf32>
    %21 = arith.mulf %19, %20 : vector<16x1xf32>
    %22 = arith.mulf %16, %16 : vector<16x1xf32>
    %23 = arith.subf %21, %22 : vector<16x1xf32>
    %24 = vector.broadcast %16 : vector<16x1xf32> to vector<16x128xf32>
    %25 = arith.subf %0, %24 : vector<16x128xf32>
    %cst_28 = arith.constant 9.99999997E-7 : f32
    %26 = vector.broadcast %cst_28 : f32 to vector<16x1xf32>
    %27 = arith.addf %23, %26 : vector<16x1xf32>
    %28 = math.rsqrt %27 : vector<16x1xf32>
    %29 = vector.broadcast %28 : vector<16x1xf32> to vector<16x128xf32>
    %30 = arith.mulf %25, %29 : vector<16x128xf32>
    %31 = vector.broadcast %1 : vector<1x128xf32> to vector<16x128xf32>
    %32 = arith.mulf %30, %31 : vector<16x128xf32>
    %33 = vector.broadcast %2 : vector<1x128xf32> to vector<16x128xf32>
    %34 = arith.addf %32, %33 : vector<16x128xf32>
    %cst_29 = arith.constant dense<0.000000e+00> : vector<16x96xf32>
    %35 = tpu.matmul %34, %3, %cst_29 {dimension_numbers = #tpu.dot_dimension_numbers<[1], [0], [0], [1], [0, 0, 1, 1], [], []>} : vector<16x128xf32>, vector<128x96xf32>, vector<16x96xf32> -> vector<16x96xf32>
    %36 = vector.broadcast %4 : vector<1x96xf32> to vector<16x96xf32>
    %37 = arith.addf %35, %36 : vector<16x96xf32>
    %cst_30 = arith.constant 3.200000e+01 : f32
    %38 = math.sqrt %cst_30 : f32
    %cst_31 = arith.constant 1.000000e+00 : f32
    %39 = arith.divf %cst_31, %38 : f32
    %40 = vector.extract_strided_slice %37 {offsets = [0, 0], sizes = [8, 8], strides = [1, 1]} : vector<16x96xf32> to vector<8x8xf32>
    %41 = vector.extract_strided_slice %37 {offsets = [0, 32], sizes = [8, 8], strides = [1, 1]} : vector<16x96xf32> to vector<8x8xf32>
    %42 = vector.extract_strided_slice %37 {offsets = [0, 64], sizes = [8, 8], strides = [1, 1]} : vector<16x96xf32> to vector<8x8xf32>
    %cst_32 = arith.constant dense<0.000000e+00> : vector<8x8xf32>
    %43 = tpu.matmul %40, %41, %cst_32 {dimension_numbers = #tpu.dot_dimension_numbers<[1], [1], [0], [0], [0, 0, 1, 0], [], []>} : vector<8x8xf32>, vector<8x8xf32>, vector<8x8xf32> -> vector<8x8xf32>
    %44 = vector.broadcast %39 : f32 to vector<8x8xf32>
    %45 = arith.mulf %43, %44 : vector<8x8xf32>
    %cst_33 = arith.constant dense<0xFF800000> : vector<8xf32>
    %46 = vector.multi_reduction <maximumf>, %45, %cst_33 [1] : vector<8x8xf32> to vector<8xf32>
    %47 = vector.shape_cast %46 : vector<8xf32> to vector<8x1xf32>
    %48 = vector.broadcast %47 : vector<8x1xf32> to vector<8x8xf32>
    %49 = arith.subf %45, %48 : vector<8x8xf32>
    %50 = math.exp %49 : vector<8x8xf32>
    %cst_34 = arith.constant dense<0.000000e+00> : vector<8xf32>
    %51 = vector.multi_reduction <add>, %50, %cst_34 [1] : vector<8x8xf32> to vector<8xf32>
    %52 = vector.shape_cast %51 : vector<8xf32> to vector<8x1xf32>
    %53 = tpu.reciprocal %52 {approx = true} : vector<8x1xf32> -> vector<8x1xf32>
    %54 = vector.broadcast %53 : vector<8x1xf32> to vector<8x8xf32>
    %55 = arith.mulf %50, %54 : vector<8x8xf32>
    %cst_35 = arith.constant dense<0.000000e+00> : vector<8x8xf32>
    %56 = tpu.matmul %55, %42, %cst_35 {dimension_numbers = #tpu.dot_dimension_numbers<[1], [0], [0], [1], [0, 0, 1, 1], [], []>} : vector<8x8xf32>, vector<8x8xf32>, vector<8x8xf32> -> vector<8x8xf32>
    %57 = vector.extract_strided_slice %5 {offsets = [0, 0], sizes = [8, 128], strides = [1, 1]} : vector<32x128xf32> to vector<8x128xf32>
    %cst_36 = arith.constant dense<0.000000e+00> : vector<8x128xf32>
    %58 = tpu.matmul %56, %57, %cst_36 {dimension_numbers = #tpu.dot_dimension_numbers<[1], [0], [0], [1], [0, 0, 1, 1], [], []>} : vector<8x8xf32>, vector<8x128xf32>, vector<8x128xf32> -> vector<8x128xf32>
    %59 = vector.extract_strided_slice %37 {offsets = [0, 8], sizes = [8, 8], strides = [1, 1]} : vector<16x96xf32> to vector<8x8xf32>
    %60 = vector.extract_strided_slice %37 {offsets = [0, 40], sizes = [8, 8], strides = [1, 1]} : vector<16x96xf32> to vector<8x8xf32>
    %61 = vector.extract_strided_slice %37 {offsets = [0, 72], sizes = [8, 8], strides = [1, 1]} : vector<16x96xf32> to vector<8x8xf32>
    %cst_37 = arith.constant dense<0.000000e+00> : vector<8x8xf32>
    %62 = tpu.matmul %59, %60, %cst_37 {dimension_numbers = #tpu.dot_dimension_numbers<[1], [1], [0], [0], [0, 0, 1, 0], [], []>} : vector<8x8xf32>, vector<8x8xf32>, vector<8x8xf32> -> vector<8x8xf32>
    %63 = vector.broadcast %39 : f32 to vector<8x8xf32>
    %64 = arith.mulf %62, %63 : vector<8x8xf32>
    %cst_38 = arith.constant dense<0xFF800000> : vector<8xf32>
    %65 = vector.multi_reduction <maximumf>, %64, %cst_38 [1] : vector<8x8xf32> to vector<8xf32>
    %66 = vector.shape_cast %65 : vector<8xf32> to vector<8x1xf32>
    %67 = vector.broadcast %66 : vector<8x1xf32> to vector<8x8xf32>
    %68 = arith.subf %64, %67 : vector<8x8xf32>
    %69 = math.exp %68 : vector<8x8xf32>
    %cst_39 = arith.constant dense<0.000000e+00> : vector<8xf32>
    %70 = vector.multi_reduction <add>, %69, %cst_39 [1] : vector<8x8xf32> to vector<8xf32>
    %71 = vector.shape_cast %70 : vector<8xf32> to vector<8x1xf32>
    %72 = tpu.reciprocal %71 {approx = true} : vector<8x1xf32> -> vector<8x1xf32>
    %73 = vector.broadcast %72 : vector<8x1xf32> to vector<8x8xf32>
    %74 = arith.mulf %69, %73 : vector<8x8xf32>
    %cst_40 = arith.constant dense<0.000000e+00> : vector<8x8xf32>
    %75 = tpu.matmul %74, %61, %cst_40 {dimension_numbers = #tpu.dot_dimension_numbers<[1], [0], [0], [1], [0, 0, 1, 1], [], []>} : vector<8x8xf32>, vector<8x8xf32>, vector<8x8xf32> -> vector<8x8xf32>
    %76 = vector.extract_strided_slice %5 {offsets = [8, 0], sizes = [8, 128], strides = [1, 1]} : vector<32x128xf32> to vector<8x128xf32>
    %cst_41 = arith.constant dense<0.000000e+00> : vector<8x128xf32>
    %77 = tpu.matmul %75, %76, %cst_41 {dimension_numbers = #tpu.dot_dimension_numbers<[1], [0], [0], [1], [0, 0, 1, 1], [], []>} : vector<8x8xf32>, vector<8x128xf32>, vector<8x128xf32> -> vector<8x128xf32>
    %78 = arith.addf %58, %77 : vector<8x128xf32>
    %79 = vector.extract_strided_slice %37 {offsets = [0, 16], sizes = [8, 8], strides = [1, 1]} : vector<16x96xf32> to vector<8x8xf32>
    %80 = vector.extract_strided_slice %37 {offsets = [0, 48], sizes = [8, 8], strides = [1, 1]} : vector<16x96xf32> to vector<8x8xf32>
    %81 = vector.extract_strided_slice %37 {offsets = [0, 80], sizes = [8, 8], strides = [1, 1]} : vector<16x96xf32> to vector<8x8xf32>
    %cst_42 = arith.constant dense<0.000000e+00> : vector<8x8xf32>
    %82 = tpu.matmul %79, %80, %cst_42 {dimension_numbers = #tpu.dot_dimension_numbers<[1], [1], [0], [0], [0, 0, 1, 0], [], []>} : vector<8x8xf32>, vector<8x8xf32>, vector<8x8xf32> -> vector<8x8xf32>
    %83 = vector.broadcast %39 : f32 to vector<8x8xf32>
    %84 = arith.mulf %82, %83 : vector<8x8xf32>
    %cst_43 = arith.constant dense<0xFF800000> : vector<8xf32>
    %85 = vector.multi_reduction <maximumf>, %84, %cst_43 [1] : vector<8x8xf32> to vector<8xf32>
    %86 = vector.shape_cast %85 : vector<8xf32> to vector<8x1xf32>
    %87 = vector.broadcast %86 : vector<8x1xf32> to vector<8x8xf32>
    %88 = arith.subf %84, %87 : vector<8x8xf32>
    %89 = math.exp %88 : vector<8x8xf32>
    %cst_44 = arith.constant dense<0.000000e+00> : vector<8xf32>
    %90 = vector.multi_reduction <add>, %89, %cst_44 [1] : vector<8x8xf32> to vector<8xf32>
    %91 = vector.shape_cast %90 : vector<8xf32> to vector<8x1xf32>
    %92 = tpu.reciprocal %91 {approx = true} : vector<8x1xf32> -> vector<8x1xf32>
    %93 = vector.broadcast %92 : vector<8x1xf32> to vector<8x8xf32>
    %94 = arith.mulf %89, %93 : vector<8x8xf32>
    %cst_45 = arith.constant dense<0.000000e+00> : vector<8x8xf32>
    %95 = tpu.matmul %94, %81, %cst_45 {dimension_numbers = #tpu.dot_dimension_numbers<[1], [0], [0], [1], [0, 0, 1, 1], [], []>} : vector<8x8xf32>, vector<8x8xf32>, vector<8x8xf32> -> vector<8x8xf32>
    %96 = vector.extract_strided_slice %5 {offsets = [16, 0], sizes = [8, 128], strides = [1, 1]} : vector<32x128xf32> to vector<8x128xf32>
    %cst_46 = arith.constant dense<0.000000e+00> : vector<8x128xf32>
    %97 = tpu.matmul %95, %96, %cst_46 {dimension_numbers = #tpu.dot_dimension_numbers<[1], [0], [0], [1], [0, 0, 1, 1], [], []>} : vector<8x8xf32>, vector<8x128xf32>, vector<8x128xf32> -> vector<8x128xf32>
    %98 = arith.addf %78, %97 : vector<8x128xf32>
    %99 = vector.extract_strided_slice %37 {offsets = [0, 24], sizes = [8, 8], strides = [1, 1]} : vector<16x96xf32> to vector<8x8xf32>
    %100 = vector.extract_strided_slice %37 {offsets = [0, 56], sizes = [8, 8], strides = [1, 1]} : vector<16x96xf32> to vector<8x8xf32>
    %101 = vector.extract_strided_slice %37 {offsets = [0, 88], sizes = [8, 8], strides = [1, 1]} : vector<16x96xf32> to vector<8x8xf32>
    %cst_47 = arith.constant dense<0.000000e+00> : vector<8x8xf32>
    %102 = tpu.matmul %99, %100, %cst_47 {dimension_numbers = #tpu.dot_dimension_numbers<[1], [1], [0], [0], [0, 0, 1, 0], [], []>} : vector<8x8xf32>, vector<8x8xf32>, vector<8x8xf32> -> vector<8x8xf32>
    %103 = vector.broadcast %39 : f32 to vector<8x8xf32>
    %104 = arith.mulf %102, %103 : vector<8x8xf32>
    %cst_48 = arith.constant dense<0xFF800000> : vector<8xf32>
    %105 = vector.multi_reduction <maximumf>, %104, %cst_48 [1] : vector<8x8xf32> to vector<8xf32>
    %106 = vector.shape_cast %105 : vector<8xf32> to vector<8x1xf32>
    %107 = vector.broadcast %106 : vector<8x1xf32> to vector<8x8xf32>
    %108 = arith.subf %104, %107 : vector<8x8xf32>
    %109 = math.exp %108 : vector<8x8xf32>
    %cst_49 = arith.constant dense<0.000000e+00> : vector<8xf32>
    %110 = vector.multi_reduction <add>, %109, %cst_49 [1] : vector<8x8xf32> to vector<8xf32>
    %111 = vector.shape_cast %110 : vector<8xf32> to vector<8x1xf32>
    %112 = tpu.reciprocal %111 {approx = true} : vector<8x1xf32> -> vector<8x1xf32>
    %113 = vector.broadcast %112 : vector<8x1xf32> to vector<8x8xf32>
    %114 = arith.mulf %109, %113 : vector<8x8xf32>
    %cst_50 = arith.constant dense<0.000000e+00> : vector<8x8xf32>
    %115 = tpu.matmul %114, %101, %cst_50 {dimension_numbers = #tpu.dot_dimension_numbers<[1], [0], [0], [1], [0, 0, 1, 1], [], []>} : vector<8x8xf32>, vector<8x8xf32>, vector<8x8xf32> -> vector<8x8xf32>
    %116 = vector.extract_strided_slice %5 {offsets = [24, 0], sizes = [8, 128], strides = [1, 1]} : vector<32x128xf32> to vector<8x128xf32>
    %cst_51 = arith.constant dense<0.000000e+00> : vector<8x128xf32>
    %117 = tpu.matmul %115, %116, %cst_51 {dimension_numbers = #tpu.dot_dimension_numbers<[1], [0], [0], [1], [0, 0, 1, 1], [], []>} : vector<8x8xf32>, vector<8x128xf32>, vector<8x128xf32> -> vector<8x128xf32>
    %118 = arith.addf %98, %117 : vector<8x128xf32>
    %119 = vector.extract_strided_slice %37 {offsets = [8, 0], sizes = [8, 8], strides = [1, 1]} : vector<16x96xf32> to vector<8x8xf32>
    %120 = vector.extract_strided_slice %37 {offsets = [8, 32], sizes = [8, 8], strides = [1, 1]} : vector<16x96xf32> to vector<8x8xf32>
    %121 = vector.extract_strided_slice %37 {offsets = [8, 64], sizes = [8, 8], strides = [1, 1]} : vector<16x96xf32> to vector<8x8xf32>
    %cst_52 = arith.constant dense<0.000000e+00> : vector<8x8xf32>
    %122 = tpu.matmul %119, %120, %cst_52 {dimension_numbers = #tpu.dot_dimension_numbers<[1], [1], [0], [0], [0, 0, 1, 0], [], []>} : vector<8x8xf32>, vector<8x8xf32>, vector<8x8xf32> -> vector<8x8xf32>
    %123 = vector.broadcast %39 : f32 to vector<8x8xf32>
    %124 = arith.mulf %122, %123 : vector<8x8xf32>
    %cst_53 = arith.constant dense<0xFF800000> : vector<8xf32>
    %125 = vector.multi_reduction <maximumf>, %124, %cst_53 [1] : vector<8x8xf32> to vector<8xf32>
    %126 = vector.shape_cast %125 : vector<8xf32> to vector<8x1xf32>
    %127 = vector.broadcast %126 : vector<8x1xf32> to vector<8x8xf32>
    %128 = arith.subf %124, %127 : vector<8x8xf32>
    %129 = math.exp %128 : vector<8x8xf32>
    %cst_54 = arith.constant dense<0.000000e+00> : vector<8xf32>
    %130 = vector.multi_reduction <add>, %129, %cst_54 [1] : vector<8x8xf32> to vector<8xf32>
    %131 = vector.shape_cast %130 : vector<8xf32> to vector<8x1xf32>
    %132 = tpu.reciprocal %131 {approx = true} : vector<8x1xf32> -> vector<8x1xf32>
    %133 = vector.broadcast %132 : vector<8x1xf32> to vector<8x8xf32>
    %134 = arith.mulf %129, %133 : vector<8x8xf32>
    %cst_55 = arith.constant dense<0.000000e+00> : vector<8x8xf32>
    %135 = tpu.matmul %134, %121, %cst_55 {dimension_numbers = #tpu.dot_dimension_numbers<[1], [0], [0], [1], [0, 0, 1, 1], [], []>} : vector<8x8xf32>, vector<8x8xf32>, vector<8x8xf32> -> vector<8x8xf32>
    %136 = vector.extract_strided_slice %5 {offsets = [0, 0], sizes = [8, 128], strides = [1, 1]} : vector<32x128xf32> to vector<8x128xf32>
    %cst_56 = arith.constant dense<0.000000e+00> : vector<8x128xf32>
    %137 = tpu.matmul %135, %136, %cst_56 {dimension_numbers = #tpu.dot_dimension_numbers<[1], [0], [0], [1], [0, 0, 1, 1], [], []>} : vector<8x8xf32>, vector<8x128xf32>, vector<8x128xf32> -> vector<8x128xf32>
    %138 = vector.extract_strided_slice %37 {offsets = [8, 8], sizes = [8, 8], strides = [1, 1]} : vector<16x96xf32> to vector<8x8xf32>
    %139 = vector.extract_strided_slice %37 {offsets = [8, 40], sizes = [8, 8], strides = [1, 1]} : vector<16x96xf32> to vector<8x8xf32>
    %140 = vector.extract_strided_slice %37 {offsets = [8, 72], sizes = [8, 8], strides = [1, 1]} : vector<16x96xf32> to vector<8x8xf32>
    %cst_57 = arith.constant dense<0.000000e+00> : vector<8x8xf32>
    %141 = tpu.matmul %138, %139, %cst_57 {dimension_numbers = #tpu.dot_dimension_numbers<[1], [1], [0], [0], [0, 0, 1, 0], [], []>} : vector<8x8xf32>, vector<8x8xf32>, vector<8x8xf32> -> vector<8x8xf32>
    %142 = vector.broadcast %39 : f32 to vector<8x8xf32>
    %143 = arith.mulf %141, %142 : vector<8x8xf32>
    %cst_58 = arith.constant dense<0xFF800000> : vector<8xf32>
    %144 = vector.multi_reduction <maximumf>, %143, %cst_58 [1] : vector<8x8xf32> to vector<8xf32>
    %145 = vector.shape_cast %144 : vector<8xf32> to vector<8x1xf32>
    %146 = vector.broadcast %145 : vector<8x1xf32> to vector<8x8xf32>
    %147 = arith.subf %143, %146 : vector<8x8xf32>
    %148 = math.exp %147 : vector<8x8xf32>
    %cst_59 = arith.constant dense<0.000000e+00> : vector<8xf32>
    %149 = vector.multi_reduction <add>, %148, %cst_59 [1] : vector<8x8xf32> to vector<8xf32>
    %150 = vector.shape_cast %149 : vector<8xf32> to vector<8x1xf32>
    %151 = tpu.reciprocal %150 {approx = true} : vector<8x1xf32> -> vector<8x1xf32>
    %152 = vector.broadcast %151 : vector<8x1xf32> to vector<8x8xf32>
    %153 = arith.mulf %148, %152 : vector<8x8xf32>
    %cst_60 = arith.constant dense<0.000000e+00> : vector<8x8xf32>
    %154 = tpu.matmul %153, %140, %cst_60 {dimension_numbers = #tpu.dot_dimension_numbers<[1], [0], [0], [1], [0, 0, 1, 1], [], []>} : vector<8x8xf32>, vector<8x8xf32>, vector<8x8xf32> -> vector<8x8xf32>
    %155 = vector.extract_strided_slice %5 {offsets = [8, 0], sizes = [8, 128], strides = [1, 1]} : vector<32x128xf32> to vector<8x128xf32>
    %cst_61 = arith.constant dense<0.000000e+00> : vector<8x128xf32>
    %156 = tpu.matmul %154, %155, %cst_61 {dimension_numbers = #tpu.dot_dimension_numbers<[1], [0], [0], [1], [0, 0, 1, 1], [], []>} : vector<8x8xf32>, vector<8x128xf32>, vector<8x128xf32> -> vector<8x128xf32>
    %157 = arith.addf %137, %156 : vector<8x128xf32>
    %158 = vector.extract_strided_slice %37 {offsets = [8, 16], sizes = [8, 8], strides = [1, 1]} : vector<16x96xf32> to vector<8x8xf32>
    %159 = vector.extract_strided_slice %37 {offsets = [8, 48], sizes = [8, 8], strides = [1, 1]} : vector<16x96xf32> to vector<8x8xf32>
    %160 = vector.extract_strided_slice %37 {offsets = [8, 80], sizes = [8, 8], strides = [1, 1]} : vector<16x96xf32> to vector<8x8xf32>
    %cst_62 = arith.constant dense<0.000000e+00> : vector<8x8xf32>
    %161 = tpu.matmul %158, %159, %cst_62 {dimension_numbers = #tpu.dot_dimension_numbers<[1], [1], [0], [0], [0, 0, 1, 0], [], []>} : vector<8x8xf32>, vector<8x8xf32>, vector<8x8xf32> -> vector<8x8xf32>
    %162 = vector.broadcast %39 : f32 to vector<8x8xf32>
    %163 = arith.mulf %161, %162 : vector<8x8xf32>
    %cst_63 = arith.constant dense<0xFF800000> : vector<8xf32>
    %164 = vector.multi_reduction <maximumf>, %163, %cst_63 [1] : vector<8x8xf32> to vector<8xf32>
    %165 = vector.shape_cast %164 : vector<8xf32> to vector<8x1xf32>
    %166 = vector.broadcast %165 : vector<8x1xf32> to vector<8x8xf32>
    %167 = arith.subf %163, %166 : vector<8x8xf32>
    %168 = math.exp %167 : vector<8x8xf32>
    %cst_64 = arith.constant dense<0.000000e+00> : vector<8xf32>
    %169 = vector.multi_reduction <add>, %168, %cst_64 [1] : vector<8x8xf32> to vector<8xf32>
    %170 = vector.shape_cast %169 : vector<8xf32> to vector<8x1xf32>
    %171 = tpu.reciprocal %170 {approx = true} : vector<8x1xf32> -> vector<8x1xf32>
    %172 = vector.broadcast %171 : vector<8x1xf32> to vector<8x8xf32>
    %173 = arith.mulf %168, %172 : vector<8x8xf32>
    %cst_65 = arith.constant dense<0.000000e+00> : vector<8x8xf32>
    %174 = tpu.matmul %173, %160, %cst_65 {dimension_numbers = #tpu.dot_dimension_numbers<[1], [0], [0], [1], [0, 0, 1, 1], [], []>} : vector<8x8xf32>, vector<8x8xf32>, vector<8x8xf32> -> vector<8x8xf32>
    %175 = vector.extract_strided_slice %5 {offsets = [16, 0], sizes = [8, 128], strides = [1, 1]} : vector<32x128xf32> to vector<8x128xf32>
    %cst_66 = arith.constant dense<0.000000e+00> : vector<8x128xf32>
    %176 = tpu.matmul %174, %175, %cst_66 {dimension_numbers = #tpu.dot_dimension_numbers<[1], [0], [0], [1], [0, 0, 1, 1], [], []>} : vector<8x8xf32>, vector<8x128xf32>, vector<8x128xf32> -> vector<8x128xf32>
    %177 = arith.addf %157, %176 : vector<8x128xf32>
    %178 = vector.extract_strided_slice %37 {offsets = [8, 24], sizes = [8, 8], strides = [1, 1]} : vector<16x96xf32> to vector<8x8xf32>
    %179 = vector.extract_strided_slice %37 {offsets = [8, 56], sizes = [8, 8], strides = [1, 1]} : vector<16x96xf32> to vector<8x8xf32>
    %180 = vector.extract_strided_slice %37 {offsets = [8, 88], sizes = [8, 8], strides = [1, 1]} : vector<16x96xf32> to vector<8x8xf32>
    %cst_67 = arith.constant dense<0.000000e+00> : vector<8x8xf32>
    %181 = tpu.matmul %178, %179, %cst_67 {dimension_numbers = #tpu.dot_dimension_numbers<[1], [1], [0], [0], [0, 0, 1, 0], [], []>} : vector<8x8xf32>, vector<8x8xf32>, vector<8x8xf32> -> vector<8x8xf32>
    %182 = vector.broadcast %39 : f32 to vector<8x8xf32>
    %183 = arith.mulf %181, %182 : vector<8x8xf32>
    %cst_68 = arith.constant dense<0xFF800000> : vector<8xf32>
    %184 = vector.multi_reduction <maximumf>, %183, %cst_68 [1] : vector<8x8xf32> to vector<8xf32>
    %185 = vector.shape_cast %184 : vector<8xf32> to vector<8x1xf32>
    %186 = vector.broadcast %185 : vector<8x1xf32> to vector<8x8xf32>
    %187 = arith.subf %183, %186 : vector<8x8xf32>
    %188 = math.exp %187 : vector<8x8xf32>
    %cst_69 = arith.constant dense<0.000000e+00> : vector<8xf32>
    %189 = vector.multi_reduction <add>, %188, %cst_69 [1] : vector<8x8xf32> to vector<8xf32>
    %190 = vector.shape_cast %189 : vector<8xf32> to vector<8x1xf32>
    %191 = tpu.reciprocal %190 {approx = true} : vector<8x1xf32> -> vector<8x1xf32>
    %192 = vector.broadcast %191 : vector<8x1xf32> to vector<8x8xf32>
    %193 = arith.mulf %188, %192 : vector<8x8xf32>
    %cst_70 = arith.constant dense<0.000000e+00> : vector<8x8xf32>
    %194 = tpu.matmul %193, %180, %cst_70 {dimension_numbers = #tpu.dot_dimension_numbers<[1], [0], [0], [1], [0, 0, 1, 1], [], []>} : vector<8x8xf32>, vector<8x8xf32>, vector<8x8xf32> -> vector<8x8xf32>
    %195 = vector.extract_strided_slice %5 {offsets = [24, 0], sizes = [8, 128], strides = [1, 1]} : vector<32x128xf32> to vector<8x128xf32>
    %cst_71 = arith.constant dense<0.000000e+00> : vector<8x128xf32>
    %196 = tpu.matmul %194, %195, %cst_71 {dimension_numbers = #tpu.dot_dimension_numbers<[1], [0], [0], [1], [0, 0, 1, 1], [], []>} : vector<8x8xf32>, vector<8x128xf32>, vector<8x128xf32> -> vector<8x128xf32>
    %197 = arith.addf %177, %196 : vector<8x128xf32>
    %198 = tpu.concatenate %118, %197 in 0 : vector<8x128xf32>, vector<8x128xf32> -> vector<16x128xf32>
    %199 = vector.broadcast %6 : vector<1x128xf32> to vector<16x128xf32>
    %200 = arith.addf %198, %199 : vector<16x128xf32>
    %201 = arith.addf %0, %200 : vector<16x128xf32>
    %cst_72 = arith.constant dense<0.000000e+00> : vector<16xf32>
    %202 = vector.multi_reduction <add>, %201, %cst_72 [1] : vector<16x128xf32> to vector<16xf32>
    %203 = vector.shape_cast %202 : vector<16xf32> to vector<16x1xf32>
    %cst_73 = arith.constant 3.125000e-02 : f32
    %204 = vector.broadcast %cst_73 : f32 to vector<16x1xf32>
    %205 = arith.mulf %203, %204 : vector<16x1xf32>
    %206 = arith.mulf %201, %201 : vector<16x128xf32>
    %cst_74 = arith.constant dense<0.000000e+00> : vector<16xf32>
    %207 = vector.multi_reduction <add>, %206, %cst_74 [1] : vector<16x128xf32> to vector<16xf32>
    %208 = vector.shape_cast %207 : vector<16xf32> to vector<16x1xf32>
    %cst_75 = arith.constant 3.125000e-02 : f32
    %209 = vector.broadcast %cst_75 : f32 to vector<16x1xf32>
    %210 = arith.mulf %208, %209 : vector<16x1xf32>
    %211 = arith.mulf %205, %205 : vector<16x1xf32>
    %212 = arith.subf %210, %211 : vector<16x1xf32>
    %213 = vector.broadcast %205 : vector<16x1xf32> to vector<16x128xf32>
    %214 = arith.subf %201, %213 : vector<16x128xf32>
    %cst_76 = arith.constant 9.99999997E-7 : f32
    %215 = vector.broadcast %cst_76 : f32 to vector<16x1xf32>
    %216 = arith.addf %212, %215 : vector<16x1xf32>
    %217 = math.rsqrt %216 : vector<16x1xf32>
    %218 = vector.broadcast %217 : vector<16x1xf32> to vector<16x128xf32>
    %219 = arith.mulf %214, %218 : vector<16x128xf32>
    %220 = vector.broadcast %7 : vector<1x128xf32> to vector<16x128xf32>
    %221 = arith.mulf %219, %220 : vector<16x128xf32>
    %222 = vector.broadcast %8 : vector<1x128xf32> to vector<16x128xf32>
    %223 = arith.addf %221, %222 : vector<16x128xf32>
    %cst_77 = arith.constant dense<0.000000e+00> : vector<16x64xf32>
    %224 = tpu.matmul %223, %9, %cst_77 {dimension_numbers = #tpu.dot_dimension_numbers<[1], [0], [0], [1], [0, 0, 1, 1], [], []>} : vector<16x128xf32>, vector<128x64xf32>, vector<16x64xf32> -> vector<16x64xf32>
    %225 = vector.broadcast %10 : vector<1x64xf32> to vector<16x64xf32>
    %226 = arith.addf %224, %225 : vector<16x64xf32>
    %cst_78 = arith.constant 0.000000e+00 : f32
    %227 = vector.broadcast %cst_78 : f32 to vector<16x64xf32>
    %228 = arith.maximumf %226, %227 : vector<16x64xf32>
    %cst_79 = arith.constant dense<0.000000e+00> : vector<16x128xf32>
    %229 = tpu.matmul %228, %11, %cst_79 {dimension_numbers = #tpu.dot_dimension_numbers<[1], [0], [0], [1], [0, 0, 1, 1], [], []>} : vector<16x64xf32>, vector<64x128xf32>, vector<16x128xf32> -> vector<16x128xf32>
    %230 = vector.broadcast %12 : vector<1x128xf32> to vector<16x128xf32>
    %231 = arith.addf %229, %230 : vector<16x128xf32>
    %232 = arith.addf %201, %231 : vector<16x128xf32>
    %c0_80 = arith.constant 0 : index
    %c0_81 = arith.constant 0 : index
    %233 = vector.load %arg13[%c0_80, %c0_81] : memref<16x128xf32, #tpu.memory_space<vmem>>, vector<16x128xf32>
    tpu.vector_store %arg13[%c0_80, %c0_81], %232 {strides = array<i32>} : memref<16x128xf32, #tpu.memory_space<vmem>>, vector<16x128xf32>,
    return
  }
}

</mosaic_0001>

<bundles_post_ra>
// kernel: tpu_custom_call.1
= control target key start
LH: loop header
LB: loop body
LE: loop exit
PB: predicated region body
PF: predicated region fallthrough
CT: control target
= control target key end

     0   :  { %s3282_s0 = inlined_call_operand.vmem [shape: f32[16,128], index: 0, kind: input, shape index: {}]   ;;  %s3283_s1 = inlined_call_operand.vmem [shape: f32[1,128], index: 1, kind: input, shape index: {}]   ;;  %s3284_s2 = inlined_call_operand.vmem [shape: f32[1,128], index: 2, kind: input, shape index: {}]   ;;  %s3285_s3 = inlined_call_operand.vmem [shape: f32[128,96], index: 3, kind: input, shape index: {}]   ;;  %s3286_s4 = inlined_call_operand.vmem [shape: f32[1,96], index: 4, kind: input, shape index: {}]   ;;  %s3287_s5 = inlined_call_operand.vmem [shape: f32[32,128], index: 5, kind: input, shape index: {}]   ;;  %s3288_s6 = inlined_call_operand.vmem [shape: f32[1,128], index: 6, kind: input, shape index: {}]   ;;  %s3289_s7 = inlined_call_operand.vmem [shape: f32[1,128], index: 7, kind: input, shape index: {}]   ;;  %s3290_s8 = inlined_call_operand.vmem [shape: f32[1,128], index: 8, kind: input, shape index: {}]   ;;  %s3291_s9 = inlined_call_operand.vmem [shape: f32[128,64], index: 9, kind: input, shape index: {}]   ;;  %s3292_s10 = inlined_call_operand.vmem [shape: f32[1,64], index: 10, kind: input, shape index: {}]   ;;  %s3293_s11 = inlined_call_operand.vmem [shape: f32[64,128], index: 11, kind: input, shape index: {}]   ;;  %s3294_s12 = inlined_call_operand.vmem [shape: f32[1,128], index: 12, kind: input, shape index: {}]   ;;  %s3295_s13 = inlined_call_operand.hbm [shape: f32[16,128], index: 13, kind: output, shape index: {}]  }
   0x1   :  { %v2892_v0 = vld [vmem:[%s3282_s0] sm:$0xff]  ;;  %v2897_v1 = vld [vmem:[%s3282_s0 + $0x8] sm:$0xff] }
   0x2   :  { %18 = vsyncpa [#allocation3], 0  ;;  %99 = vadd.xlane.f32.xlu0 %v2892_v0  ;;  %v105_v2 = vmul.f32 %v2892_v0, %v2892_v0  ;;  %v106_v3 = vmul.f32 %v2897_v1, %v2897_v1  ;;  %v64_v4 = vld [vmem:[%s3285_s3 + $0x78] sm:$0xff]  ;;  %v63_v5 = vld [vmem:[%s3285_s3 + $0x70] sm:$0xff]  ;;  %v2803_v46 = vmov 0.0   ;;  %vm2804_vm0 = vmmov 0  }
   0x3   :  { %2516 = vmatprep.subr.mxu0 %v64_v4  ;;  %v62_v6 = vld [vmem:[%s3285_s3 + $0x68] sm:$0xff]  ;;  %v61_v7 = vld [vmem:[%s3285_s3 + $0x60] sm:$0xff]  ;;  %v60_v8 = vld [vmem:[%s3285_s3 + $0x58] sm:$0xff]  ;;  %2551 = vmatprep.subr.mxu1 %v2803_v46  ;;  %s2805_s28 = smov 96   ;;  %s2806_s29 = smov 88   ;;  %vm225_vm1 = vcmask 64512  }
   0x4   :  { %107 = vadd.xlane.f32.xlu1 %v105_v2  ;;  %2517 = vmatpush3.msra.mxu0 %v64_v4  ;;  %v59_v9 = vld [vmem:[%s3285_s3 + $0x50] sm:$0xff]  ;;  %v58_v10 = vld [vmem:[%s3285_s3 + $0x48] sm:$0xff]  ;;  %v57_v11 = vld [vmem:[%s3285_s3 + $0x40] sm:$0xff]  ;;  %s2808_s30 = smov 120   ;;  %s2809_s0 = smov 56   ;;  %vm2278_vm2 = vcmask 523264  }
   0x5   :  { %2518 = vmatprep.subr.mxu0 %v63_v5  ;;  %v56_v12 = vld [vmem:[%s3285_s3 + $0x38] sm:$0xff]  ;;  %v55_v13 = vld [vmem:[%s3285_s3 + $0x30] sm:$0xff]  ;;  %v54_v14 = vld [vmem:[%s3285_s3 + $0x28] sm:$0xff]  ;;  %2553 = vmatprep.mubr.msk.f32.mxu1 %vm2804_vm0, %v2803_v46  ;;  %s2810_s14 = smov 112   ;;  %s2811_s15 = smov 80  }
   0x6   :  { %101 = vadd.xlane.f32.xlu0 %v2897_v1  ;;  %2519 = vmatpush3.msra.mxu0 %v63_v5  ;;  %v53_v15 = vld [vmem:[%s3285_s3 + $0x20] sm:$0xff]  ;;  %v52_v16 = vld [vmem:[%s3285_s3 + $0x18] sm:$0xff]  ;;  %v51_v17 = vld [vmem:[%s3285_s3 + $0x10] sm:$0xff]  ;;  %s2812_s20 = smov 72   ;;  %s2813_s21 = smov 104  }
   0x7   :  { %2520 = vmatprep.subr.mxu0 %v62_v6  ;;  %v50_v18 = vld [vmem:[%s3285_s3 + $0x8] sm:$0xff]  ;;  %v49_v19 = vld [vmem:[%s3285_s3] sm:$0xff]  ;;  %s2814_s22 = smov 48   ;;  %s2815_s3 = smov 40  }
   0x8   :  { %109 = vadd.xlane.f32.xlu1 %v106_v3  ;;  %2521 = vmatpush3.msra.mxu0 %v62_v6  ;;  %v2380_v36 = vld [vmem:[%s3283_s1] ss:$0 sm:$0xff] }
   0x9   :  { %2522 = vmatprep.subr.mxu0 %v61_v7  ;;  %v2381_v38 = vld [vmem:[%s3284_s2] ss:$0 sm:$0xff] }
   0xa   :  { %2523 = vmatpush3.msra.mxu0 %v61_v7  ;;  %v2382_v47 = vld [vmem:[%s3286_s4] ss:$0 sm:$0xff]  ;;  %s2807_s4 = smov 64  }
   0xb   :  { %2524 = vmatprep.subr.mxu0 %v60_v8 }
   0xc   :  { %2525 = vmatpush3.msra.mxu0 %v60_v8 }
   0xd   :  { %2526 = vmatprep.subr.mxu0 %v59_v9 }
   0xe   :  { %2527 = vmatpush3.msra.mxu0 %v59_v9 }
   0xf   :  { %2528 = vmatprep.subr.mxu0 %v58_v10 }
  0x10   :  { %2529 = vmatpush3.msra.mxu0 %v58_v10 }
  0x11   :  { %2530 = vmatprep.subr.mxu0 %v57_v11 }
  0x12   :  { %2531 = vmatpush3.msra.mxu0 %v57_v11 }
  0x13   :  { %2532 = vmatprep.subr.mxu0 %v56_v12 }
  0x14   :  { %2533 = vmatpush3.msra.mxu0 %v56_v12 }
  0x15   :  { %2534 = vmatprep.subr.mxu0 %v55_v13 }
  0x16   :  { %2535 = vmatpush3.msra.mxu0 %v55_v13 }
  0x17   :  { %2536 = vmatprep.subr.mxu0 %v54_v14 }
  0x18   :  { %2537 = vmatpush3.msra.mxu0 %v54_v14 }
  0x19   :  { %2538 = vmatprep.subr.mxu0 %v53_v15 }
  0x1a   :  { %2539 = vmatpush3.msra.mxu0 %v53_v15 }
  0x1b   :  { %2540 = vmatprep.subr.mxu0 %v52_v16 }
  0x1c   :  { %2541 = vmatpush3.msra.mxu0 %v52_v16 }
  0x1d   :  { %2542 = vmatprep.subr.mxu0 %v51_v17 }
  0x1e   :  { %2543 = vmatpush3.msra.mxu0 %v51_v17 }
  0x1f   :  { %2544 = vmatprep.subr.mxu0 %v50_v18 }
  0x20   :  { %2545 = vmatpush3.msra.mxu0 %v50_v18 }
  0x21   :  { %2546 = vmatprep.subr.mxu0 %v49_v19 }
  0x22   :  { %2547 = vmatpush3.msra.mxu0 %v49_v19 }
  0x23   :  { %2611 = vmatprep.subr.mxu0 %v2803_v46 }
  0x8b   :  { %v100_v20 = vpop.xlane.xlu0 %99 }
  0x8c   :  { %v103_v21 = vmul.f32 0.03125, %v100_v20 }
  0x8d   :  { %v108_v22 = vpop.xlane.xlu1 %107 }
  0x8e   :  { %v113_v23 = vmul.f32 %v103_v21, %v103_v21  ;;  %v111_v24 = vmul.f32 0.03125, %v108_v22  ;;  %v117_v34 = vsub.f32 %v2892_v0, %v103_v21  ;;  %v3011_v21 = vld [vmem:[%s3287_s5 + $0x8] sm:$0xff]  ;;  %v3021_v22 = vld [vmem:[%s3287_s5] sm:$0xff] }
  0x8f   :  { %v102_v25 = vpop.xlane.xlu0 %101 }
  0x90   :  { %v115_v26 = vsub.f32 %v111_v24, %v113_v23  ;;  %v104_v27 = vmul.f32 0.03125, %v102_v25 }
  0x91   :  { %v110_v28 = vpop.xlane.xlu1 %109 }
  0x92   :  { %v119_v29 = vadd.f32 1e-06, %v115_v26  ;;  %v114_v30 = vmul.f32 %v104_v27, %v104_v27  ;;  %v112_v31 = vmul.f32 0.03125, %v110_v28  ;;  %v118_v39 = vsub.f32 %v2897_v1, %v104_v27 }
  0x94   :  { %2741 = vrsqrt.f32 %v119_v29  ;;  %v116_v32 = vsub.f32 %v112_v31, %v114_v30 }
  0x96   :  { %v120_v33 = vadd.f32 1e-06, %v116_v32 }
  0x98   :  { %2743 = vrsqrt.f32 %v120_v33 }
  0xa1   :  { %v2742_v35 = vpop.eup %2741 }
  0xa2   :  { %v123_v37 = vmul.f32 %v2742_v35, %v117_v34 }
  0xa4   :  { %v131_v40 = vmul.f32 %v2380_v36, %v123_v37 }
  0xa5   :  { %v2744_v41 = vpop.eup %2743 }
  0xa6   :  { %v124_v42 = vmul.f32 %v2744_v41, %v118_v39  ;;  %v139_v43 = vadd.f32 %v2381_v38, %v131_v40 }
  0xa8   :  { %v132_v44 = vmul.f32 %v2380_v36, %v124_v42  ;;  %2548 = vmatprep.mubr.f32.mxu0 %v139_v43 }
  0xaa   :  { %v140_v45 = vadd.f32 %v2381_v38, %v132_v44 }
  0xac   :  { %2549 = vmatmul.mubr.f32.vlgmr.msra.gmra.mxu0 %v140_v45 }
  0xad   :  { %2613 = vmatprep.mubr.msk.f32.mxu0 %vm2804_vm0, %v2803_v46 }
 0x16c   :  { %v2550_v48 = vpop.f32.mrf.mxu0 }
 0x16d   :  { %v2970_v49 = vadd.f32 %v2550_v48, %v2382_v47 }
 0x16e   :  { %v213_v50 = vpop.f32.mrf.mxu0 }
 0x16f   :  { %v2972_v51 = vadd.f32 %v2382_v47, %v213_v50 }
 0x171   :  { %223 = vrot.lane.b32.xlu0 %v2972_v51, %s2805_s28 }
 0x175   :  { %390 = vrot.lane.b32.xlu0 %v2972_v51, %s2806_s29 }
 0x1e3   :  { %v224_v52 = vpop.permute.xlu0 %223 }
 0x1e4   :  { %2552 = vmatpush3.xpose.msk.msra.mxu1 %vm225_vm1, %v224_v52 }
 0x1e5   :  { %2556 = vmatprep.subr.mxu1 %v2803_v46 }
 0x1e7   :  { %2554 = vmatmul.mubr.msk.f32.vlgmr.msra.gmra.mxu1 %vm225_vm1, %v2972_v51  ;;  %v391_v4 = vpop.permute.xlu0 %390 }
 0x1e8   :  { %2558 = vmatprep.mubr.msk.f32.mxu1 %vm2804_vm0, %v2803_v46 }
 0x2a7   :  { %v296_v53 = vpop.f32.mrf.mxu1 }
 0x2a8   :  { %v300_v54 = vmul.f32 0.17677669, %v296_v53  ;;  %v3072_v53 = vld [vmem:[%s3287_s5 + $0x10] sm:$0xff] }
 0x2a9   :  { %v2555_v55 = vpop.f32.mrf.mxu1 }
 0x2aa   :  { %v301_v56 = vsel %vm225_vm1, %v300_v54, -inf }
 0x2ab   :  { %302 = vmax.xlane.f32.xlu1 %v301_v56 }
 0x2bc   :  { %312 = vrot.lane.b32.xlu1 %v2972_v51, %s2807_s4 }
 0x334   :  { %v303_v57 = vpop.xlane.xlu1 %302 }
 0x335   :  { %v304_v58 = vsub.f32 %v300_v54, %v303_v57 }
 0x337   :  { %v305_v59 = vmul.f32 1.442695, %v304_v58 }
 0x338   :  { %v313_v60 = vpop.permute.xlu1 %312 }
 0x339   :  { %2745 = vpow2.f32 %v305_v59  ;;  %2557 = vmatpush3.msra.mxu1 %v313_v60 }
 0x33a   :  { %2561 = vmatprep.subr.mxu1 %v2803_v46 }
 0x346   :  { %v2746_v61 = vpop.eup %2745 }
 0x347   :  { %v307_v62 = vsel %vm225_vm1, %v2746_v61, 0.0 }
 0x348   :  { %308 = vadd.xlane.f32.xlu1 %v307_v62 }
 0x359   :  { %388 = vrot.lane.b32.xlu1 %v2972_v51, %s2808_s30 }
 0x3d1   :  { %v309_v63 = vpop.xlane.xlu1 %308 }
 0x3d2   :  { %2747 = vrcp.f32 %v309_v63 }
 0x3d5   :  { %v389_v5 = vpop.permute.xlu1 %388 }
 0x3df   :  { %v2748_v2 = vpop.eup %2747 }
 0x3e0   :  { %v311_v3 = vmul.f32 %v2748_v2, %v2746_v61 }
 0x3e2   :  { %2559 = vmatmul.mubr.msk.f32.vlgmr.msra.gmra.mxu1 %vm225_vm1, %v311_v3 }
 0x3e3   :  { %2562 = vmatpush3.xpose.msk.msra.mxu1 %vm225_vm1, %v391_v4  ;;  %2563 = vmatprep.mubr.msk.f32.mxu1 %vm2804_vm0, %v2803_v46 }
 0x3e4   :  { %2566 = vmatprep.subr.mxu1 %v2803_v46 }
 0x3e6   :  { %2564 = vmatmul.mubr.msk.f32.vlgmr.msra.gmra.mxu1 %vm225_vm1, %v389_v5 }
 0x3e7   :  { %2568 = vmatprep.mubr.msk.f32.mxu1 %vm2804_vm0, %v2803_v46 }
 0x4a2   :  { %v384_v6 = vpop.f32.mrf.mxu1 }
 0x4a4   :  { %v2560_v7 = vpop.f32.mrf.mxu1 }
 0x4a6   :  { %v462_v8 = vpop.f32.mrf.mxu1 }
 0x4a7   :  { %v466_v9 = vmul.f32 0.17677669, %v462_v8 }
 0x4a8   :  { %v2565_v10 = vpop.f32.mrf.mxu1 }
 0x4a9   :  { %v467_v11 = vsel %vm225_vm1, %v466_v9, -inf }
 0x4aa   :  { %468 = vmax.xlane.f32.xlu0 %v467_v11 }
 0x4c0   :  { %478 = vrot.lane.b32.xlu0 %v2972_v51, %s2809_s0 }
 0x4c4   :  { %700 = vrot.lane.b32.xlu0 %v2972_v51, %s2810_s14 }
 0x533   :  { %v469_v12 = vpop.xlane.xlu0 %468 }
 0x534   :  { %v470_v13 = vsub.f32 %v466_v9, %v469_v12 }
 0x536   :  { %v471_v14 = vmul.f32 1.442695, %v470_v13 }
 0x537   :  { %v479_v15 = vpop.permute.xlu0 %478 }
 0x538   :  { %2749 = vpow2.f32 %v471_v14  ;;  %2567 = vmatpush3.msra.mxu1 %v479_v15 }
 0x539   :  { %2571 = vmatprep.subr.mxu1 %v2803_v46 }
 0x53b   :  { %v701_v26 = vpop.permute.xlu0 %700 }
 0x545   :  { %v2750_v16 = vpop.eup %2749 }
 0x546   :  { %v473_v17 = vsel %vm225_vm1, %v2750_v16, 0.0 }
 0x547   :  { %474 = vadd.xlane.f32.xlu1 %v473_v17 }
 0x558   :  { %702 = vrot.lane.b32.xlu1 %v2972_v51, %s2811_s15 }
 0x5d0   :  { %v475_v18 = vpop.xlane.xlu1 %474 }
 0x5d1   :  { %2751 = vrcp.f32 %v475_v18 }
 0x5d4   :  { %v703_v25 = vpop.permute.xlu1 %702 }
 0x5de   :  { %v2752_v19 = vpop.eup %2751 }
 0x5df   :  { %v477_v20 = vmul.f32 %v2752_v19, %v2750_v16 }
 0x5e1   :  { %2569 = vmatmul.mubr.msk.f32.vlgmr.msra.gmra.mxu1 %vm225_vm1, %v477_v20 }
 0x5e2   :  { %2572 = vmatpush3.msra.mxu1 %v3011_v21  ;;  %2573 = vmatprep.mubr.msk.f32.mxu1 %vm2804_vm0, %v2803_v46 }
 0x5e3   :  { %2576 = vmatprep.subr.mxu1 %v2803_v46 }
 0x6a1   :  { %v550_v23 = vpop.f32.mrf.mxu1 }
 0x6a2   :  { %2574 = vmatmul.mubr.msk.f32.vlgmr.msra.gmra.mxu1 %vm225_vm1, %v550_v23 }
 0x6a3   :  { %2577 = vmatpush3.msra.mxu1 %v3021_v22  ;;  %v2570_v24 = vpop.f32.mrf.mxu1  ;;  %2578 = vmatprep.mubr.msk.f32.mxu1 %vm2804_vm0, %v2803_v46 }
 0x6a4   :  { %2581 = vmatprep.subr.mxu1 %v2803_v46 }
 0x6a6   :  { %2579 = vmatmul.mubr.msk.f32.vlgmr.msra.gmra.mxu1 %vm225_vm1, %v384_v6 }
 0x6a7   :  { %2582 = vmatpush3.xpose.msk.msra.mxu1 %vm225_vm1, %v703_v25  ;;  %2583 = vmatprep.mubr.msk.f32.mxu1 %vm2804_vm0, %v2803_v46 }
 0x6a8   :  { %2586 = vmatprep.subr.mxu1 %v2803_v46 }
 0x6aa   :  { %2584 = vmatmul.mubr.msk.f32.vlgmr.msra.gmra.mxu1 %vm225_vm1, %v701_v26 }
 0x6ab   :  { %2588 = vmatprep.mubr.msk.f32.mxu1 %vm2804_vm0, %v2803_v46 }
 0x762   :  { %v623_v27 = vpop.f32.mrf.mxu1 }
 0x764   :  { %v2575_v28 = vpop.f32.mrf.mxu1 }
 0x765   :  { %v3107_v28 = vld [vmem:[%s3287_s5 + $0x18] sm:$0xff] }
 0x766   :  { %v696_v29 = vpop.f32.mrf.mxu1 }
 0x767   :  { %v3036_v30 = vadd.f32 %v696_v29, %v623_v27 }
 0x768   :  { %v2580_v31 = vpop.f32.mrf.mxu1 }
 0x76a   :  { %v774_v32 = vpop.f32.mrf.mxu1 }
 0x76b   :  { %v778_v33 = vmul.f32 0.17677669, %v774_v32 }
 0x76c   :  { %v2585_v34 = vpop.f32.mrf.mxu1 }
 0x76d   :  { %v779_v35 = vsel %vm225_vm1, %v778_v33, -inf }
 0x76e   :  { %780 = vmax.xlane.f32.xlu1 %v779_v35 }
 0x77f   :  { %942 = vrot.lane.b32.xlu1 %v2972_v51, %s2812_s20 }
 0x783   :  { %940 = vrot.lane.b32.xlu1 %v2972_v51, %s2813_s21 }
 0x787   :  { %1347 = vrot.lane.b32.xlu1 %v2970_v49, %s2806_s29 }
 0x7f7   :  { %v781_v36 = vpop.xlane.xlu1 %780 }
 0x7f8   :  { %v782_v37 = vsub.f32 %v778_v33, %v781_v36 }
 0x7fa   :  { %v783_v38 = vmul.f32 1.442695, %v782_v37 }
 0x7fb   :  { %v943_v41 = vpop.permute.xlu1 %942 }
 0x7fc   :  { %2753 = vpow2.f32 %v783_v38 }
 0x7ff   :  { %v941_v44 = vpop.permute.xlu1 %940 }
 0x803   :  { %v1348_v47 = vpop.permute.xlu1 %1347 }
 0x809   :  { %v2754_v39 = vpop.eup %2753 }
 0x80a   :  { %v785_v40 = vsel %vm225_vm1, %v2754_v39, 0.0 }
 0x80b   :  { %786 = vadd.xlane.f32.xlu0 %v785_v40 }
 0x821   :  { %790 = vrot.lane.b32.xlu0 %v2972_v51, %s2814_s22 }
 0x825   :  { %1181 = vrot.lane.b32.xlu0 %v2970_v49, %s2805_s28 }
 0x829   :  { %1345 = vrot.lane.b32.xlu0 %v2970_v49, %s2808_s30 }
 0x894   :  { %v787_v42 = vpop.xlane.xlu0 %786 }
 0x895   :  { %2755 = vrcp.f32 %v787_v42 }
 0x898   :  { %v791_v43 = vpop.permute.xlu0 %790 }
 0x899   :  { %2587 = vmatpush3.msra.mxu1 %v791_v43 }
 0x89a   :  { %2591 = vmatprep.subr.mxu1 %v2803_v46 }
 0x89c   :  { %v1182_v45 = vpop.permute.xlu0 %1181 }
 0x89d   :  { %2612 = vmatpush3.xpose.msk.msra.mxu0 %vm225_vm1, %v1182_v45 }
 0x89e   :  { %2621 = vmatprep.subr.mxu0 %v2803_v46 }
 0x8a0   :  { %2614 = vmatmul.mubr.msk.f32.vlgmr.msra.gmra.mxu0 %vm225_vm1, %v2970_v49  ;;  %v1346_v50 = vpop.permute.xlu0 %1345 }
 0x8a1   :  { %2622 = vmatpush3.xpose.msk.msra.mxu0 %vm225_vm1, %v1348_v47  ;;  %2623 = vmatprep.mubr.msk.f32.mxu0 %vm2804_vm0, %v2803_v46 }
 0x8a2   :  { %v2756_v48 = vpop.eup %2755  ;;  %2631 = vmatprep.subr.mxu0 %v2803_v46 }
 0x8a3   :  { %v789_v52 = vmul.f32 %v2756_v48, %v2754_v39 }
 0x8a4   :  { %2624 = vmatmul.mubr.msk.f32.vlgmr.msra.gmra.mxu0 %vm225_vm1, %v1346_v50 }
 0x8a5   :  { %2589 = vmatmul.mubr.msk.f32.vlgmr.msra.gmra.mxu1 %vm225_vm1, %v789_v52  ;;  %2632 = vmatpush3.msra.mxu0 %v3011_v21 }
 0x8a6   :  { %2593 = vmatprep.mubr.msk.f32.mxu1 %vm2804_vm0, %v2803_v46  ;;  %2633 = vmatprep.mubr.msk.f32.mxu0 %vm2804_vm0, %v2803_v46 }
 0x8a7   :  { %2641 = vmatprep.subr.mxu0 %v2803_v46  ;;  %2592 = vmatpush3.msra.mxu1 %v3072_v53 }
 0x8a8   :  { %2596 = vmatprep.subr.mxu1 %v2803_v46 }
 0x960   :  { %v1253_v54 = vpop.f32.mrf.mxu0 }
 0x961   :  { %v1257_v4 = vmul.f32 0.17677669, %v1253_v54 }
 0x962   :  { %v2615_v55 = vpop.f32.mrf.mxu0 }
 0x963   :  { %v1258_v7 = vsel %vm225_vm1, %v1257_v4, -inf }
 0x964   :  { %v1419_v56 = vpop.f32.mrf.mxu0 }
 0x965   :  { %v862_v57 = vpop.f32.mrf.mxu1  ;;  %v1423_v6 = vmul.f32 0.17677669, %v1419_v56 }
 0x966   :  { %2594 = vmatmul.mubr.msk.f32.vlgmr.msra.gmra.mxu1 %vm225_vm1, %v862_v57  ;;  %v2625_v58 = vpop.f32.mrf.mxu0 }
 0x967   :  { %2597 = vmatpush3.xpose.msk.msra.mxu1 %vm225_vm1, %v943_v41  ;;  %v2590_v59 = vpop.f32.mrf.mxu1  ;;  %2598 = vmatprep.mubr.msk.f32.mxu1 %vm2804_vm0, %v2803_v46  ;;  %v1424_v8 = vsel %vm225_vm1, %v1423_v6, -inf }
 0x968   :  { %2601 = vmatprep.subr.mxu1 %v2803_v46 }
 0x96a   :  { %2599 = vmatmul.mubr.msk.f32.vlgmr.msra.gmra.mxu1 %vm225_vm1, %v941_v44 }
 0x96b   :  { %2603 = vmatprep.mubr.msk.f32.mxu1 %vm2804_vm0, %v2803_v46 }
 0xa26   :  { %v935_v60 = vpop.f32.mrf.mxu1 }
 0xa27   :  { %v3085_v61 = vadd.f32 %v935_v60, %v3036_v30 }
 0xa28   :  { %v2595_v62 = vpop.f32.mrf.mxu1 }
 0xa2a   :  { %v1014_v63 = vpop.f32.mrf.mxu1 }
 0xa2b   :  { %v1018_v2 = vmul.f32 0.17677669, %v1014_v63 }
 0xa2c   :  { %v2600_v3 = vpop.f32.mrf.mxu1 }
 0xa2d   :  { %v1019_v5 = vsel %vm225_vm1, %v1018_v2, -inf }
 0xa2e   :  { %1020 = vmax.xlane.f32.xlu1 %v1019_v5 }
 0xa32   :  { %1259 = vmax.xlane.f32.xlu1 %v1258_v7 }
 0xa36   :  { %1425 = vmax.xlane.f32.xlu1 %v1424_v8 }
 0xab7   :  { %v1021_v9 = vpop.xlane.xlu1 %1020 }
 0xab8   :  { %v1022_v10 = vsub.f32 %v1018_v2, %v1021_v9 }
 0xaba   :  { %v1023_v11 = vmul.f32 1.442695, %v1022_v10  ;;  %v2415_v10 = vld [vmem:[%s3288_s6] ss:$0 sm:$0xff] }
 0xabb   :  { %v1260_v12 = vpop.xlane.xlu1 %1259 }
 0xabc   :  { %2757 = vpow2.f32 %v1023_v11  ;;  %v1261_v13 = vsub.f32 %v1257_v4, %v1260_v12 }
 0xabe   :  { %v1262_v14 = vmul.f32 1.442695, %v1261_v13 }
 0xabf   :  { %v1426_v15 = vpop.xlane.xlu1 %1425 }
 0xac0   :  { %2759 = vpow2.f32 %v1262_v14  ;;  %v1427_v16 = vsub.f32 %v1423_v6, %v1426_v15 }
 0xac2   :  { %v1428_v17 = vmul.f32 1.442695, %v1427_v16 }
 0xac4   :  { %2761 = vpow2.f32 %v1428_v17 }
 0xac9   :  { %v2758_v18 = vpop.eup %2757 }
 0xaca   :  { %v1025_v19 = vsel %vm225_vm1, %v2758_v18, 0.0 }
 0xacb   :  { %1026 = vadd.xlane.f32.xlu0 %v1025_v19 }
 0xacd   :  { %v2760_v20 = vpop.eup %2759 }
 0xace   :  { %v1264_v21 = vsel %vm225_vm1, %v2760_v20, 0.0 }
 0xacf   :  { %1265 = vadd.xlane.f32.xlu1 %v1264_v21 }
 0xad1   :  { %v2762_v23 = vpop.eup %2761 }
 0xad2   :  { %v1430_v24 = vsel %vm225_vm1, %v2762_v23, 0.0 }
 0xad3   :  { %1431 = vadd.xlane.f32.xlu1 %v1430_v24 }
 0xae1   :  { %1030 = vrot.lane.b32.xlu0 %v2972_v51, %s2815_s3 }
 0xae4   :  { %1269 = vrot.lane.b32.xlu1 %v2970_v49, %s2807_s4 }
 0xae5   :  { %1435 = vrot.lane.b32.xlu0 %v2970_v49, %s2809_s0 }
 0xae9   :  { %1659 = vrot.lane.b32.xlu0 %v2970_v49, %s2811_s15 }
 0xaed   :  { %1657 = vrot.lane.b32.xlu0 %v2970_v49, %s2810_s14 }
 0xb54   :  { %v1027_v25 = vpop.xlane.xlu0 %1026 }
 0xb55   :  { %2763 = vrcp.f32 %v1027_v25 }
 0xb58   :  { %v1031_v26 = vpop.permute.xlu0 %1030  ;;  %v1266_v29 = vpop.xlane.xlu1 %1265 }
 0xb59   :  { %2602 = vmatpush3.msra.mxu1 %v1031_v26  ;;  %2765 = vrcp.f32 %v1266_v29 }
 0xb5a   :  { %2606 = vmatprep.subr.mxu1 %v2803_v46 }
 0xb5c   :  { %v1432_v30 = vpop.xlane.xlu1 %1431  ;;  %v1436_v37 = vpop.permute.xlu0 %1435 }
 0xb5d   :  { %2767 = vrcp.f32 %v1432_v30 }
 0xb60   :  { %v1270_v33 = vpop.permute.xlu1 %1269  ;;  %v1660_v43 = vpop.permute.xlu0 %1659 }
 0xb62   :  { %v2764_v27 = vpop.eup %2763 }
 0xb63   :  { %v1029_v51 = vmul.f32 %v2764_v27, %v2758_v18 }
 0xb64   :  { %v1658_v47 = vpop.permute.xlu0 %1657 }
 0xb65   :  { %2604 = vmatmul.mubr.msk.f32.vlgmr.msra.gmra.mxu1 %vm225_vm1, %v1029_v51 }
 0xb66   :  { %2607 = vmatpush3.msra.mxu1 %v3107_v28  ;;  %2608 = vmatprep.mubr.msk.f32.mxu1 %vm2804_vm0, %v2803_v46  ;;  %v2766_v31 = vpop.eup %2765 }
 0xb67   :  { %2616 = vmatprep.subr.mxu1 %v2803_v46  ;;  %v1268_v35 = vmul.f32 %v2766_v31, %v2760_v20 }
 0xb6a   :  { %v2768_v36 = vpop.eup %2767 }
 0xb6b   :  { %v1434_v38 = vmul.f32 %v2768_v36, %v2762_v23 }
 0xc25   :  { %v1102_v32 = vpop.f32.mrf.mxu1 }
 0xc26   :  { %2609 = vmatmul.mubr.msk.f32.vlgmr.msra.gmra.mxu1 %vm225_vm1, %v1102_v32 }
 0xc27   :  { %2617 = vmatpush3.msra.mxu1 %v1270_v33  ;;  %v2605_v34 = vpop.f32.mrf.mxu1  ;;  %2618 = vmatprep.mubr.msk.f32.mxu1 %vm2804_vm0, %v2803_v46 }
 0xc28   :  { %2626 = vmatprep.subr.mxu1 %v2803_v46 }
 0xc2a   :  { %2619 = vmatmul.mubr.msk.f32.vlgmr.msra.gmra.mxu1 %vm225_vm1, %v1268_v35 }
 0xc2b   :  { %2627 = vmatpush3.msra.mxu1 %v1436_v37  ;;  %2628 = vmatprep.mubr.msk.f32.mxu1 %vm2804_vm0, %v2803_v46  ;;  %v3185_v37 = vld [vmem:[%s3290_s8] ss:$0 sm:$0xff] }
 0xc2c   :  { %2636 = vmatprep.subr.mxu1 %v2803_v46 }
 0xc2e   :  { %2629 = vmatmul.mubr.msk.f32.vlgmr.msra.gmra.mxu1 %vm225_vm1, %v1434_v38 }
 0xc2f   :  { %2637 = vmatpush3.msra.mxu1 %v3021_v22  ;;  %2638 = vmatprep.mubr.msk.f32.mxu1 %vm2804_vm0, %v2803_v46 }
 0xc30   :  { %2646 = vmatprep.subr.mxu1 %v2803_v46 }
 0xce6   :  { %v1175_v39 = vpop.f32.mrf.mxu1 }
 0xce7   :  { %v1179_v40 = vadd.f32 %v1175_v39, %v3085_v61 }
 0xce8   :  { %v2610_v41 = vpop.f32.mrf.mxu1 }
 0xce9   :  { %v2143_v13 = vadd.f32 %v2415_v10, %v1179_v40 }
 0xcea   :  { %v1341_v42 = vpop.f32.mrf.mxu1 }
 0xceb   :  { %2639 = vmatmul.mubr.msk.f32.vlgmr.msra.gmra.mxu1 %vm225_vm1, %v1341_v42  ;;  %v3167_v16 = vadd.f32 %v2143_v13, %v2892_v0 }
 0xcec   :  { %v2620_v44 = vpop.f32.mrf.mxu1  ;;  %2648 = vmatprep.mubr.msk.f32.mxu1 %vm2804_vm0, %v2803_v46 }
 0xced   :  { %v2153_v17 = vmul.f32 %v3167_v16, %v3167_v16 }
 0xcee   :  { %v1507_v45 = vpop.f32.mrf.mxu1 }
 0xcef   :  { %2634 = vmatmul.mubr.msk.f32.vlgmr.msra.gmra.mxu0 %vm225_vm1, %v1507_v45 }
 0xcf0   :  { %2642 = vmatpush3.xpose.msk.msra.mxu0 %vm225_vm1, %v1660_v43  ;;  %v2630_v22 = vpop.f32.mrf.mxu1  ;;  %2643 = vmatprep.mubr.msk.f32.mxu0 %vm2804_vm0, %v2803_v46  ;;  %v88_v43 = vld [vmem:[%s3291_s9 + $0x78] sm:$0xff] }
 0xcf1   :  { %2651 = vmatprep.subr.mxu0 %v2803_v46 }
 0xcf3   :  { %2644 = vmatmul.mubr.msk.f32.vlgmr.msra.gmra.mxu0 %vm225_vm1, %v1658_v47 }
 0xcf4   :  { %2652 = vmatpush3.msra.mxu0 %v3072_v53  ;;  %2653 = vmatprep.mubr.msk.f32.mxu0 %vm2804_vm0, %v2803_v46 }
 0xcf5   :  { %2661 = vmatprep.subr.mxu0 %v2803_v46 }
 0xdab   :  { %v1653_v48 = vpop.f32.mrf.mxu1 }
 0xdad   :  { %v2640_v50 = vpop.f32.mrf.mxu1 }
 0xdaf   :  { %v1580_v52 = vpop.f32.mrf.mxu0 }
 0xdb0   :  { %v1654_v54 = vadd.f32 %v1653_v48, %v1580_v52  ;;  %v87_v52 = vld [vmem:[%s3291_s9 + $0x70] sm:$0xff] }
 0xdb1   :  { %v2635_v55 = vpop.f32.mrf.mxu0 }
 0xdb2   :  { %v84_v55 = vld [vmem:[%s3291_s9 + $0x58] sm:$0xff] }
 0xdb3   :  { %v1731_v56 = vpop.f32.mrf.mxu0 }
 0xdb4   :  { %v1735_v57 = vmul.f32 0.17677669, %v1731_v56  ;;  %v83_v56 = vld [vmem:[%s3291_s9 + $0x50] sm:$0xff] }
 0xdb5   :  { %v2645_v58 = vpop.f32.mrf.mxu0 }
 0xdb6   :  { %v1736_v59 = vsel %vm225_vm1, %v1735_v57, -inf  ;;  %v81_v58 = vld [vmem:[%s3291_s9 + $0x40] sm:$0xff] }
 0xdb7   :  { %1737 = vmax.xlane.f32.xlu0 %v1736_v59  ;;  %v80_v59 = vld [vmem:[%s3291_s9 + $0x38] sm:$0xff] }
 0xdcd   :  { %1747 = vrot.lane.b32.xlu0 %v2970_v49, %s2814_s22 }
 0xdd1   :  { %1897 = vrot.lane.b32.xlu0 %v2970_v49, %s2813_s21 }
 0xe40   :  { %v1738_v53 = vpop.xlane.xlu0 %1737 }
 0xe41   :  { %v1739_v60 = vsub.f32 %v1735_v57, %v1738_v53  ;;  %v82_v57 = vld [vmem:[%s3291_s9 + $0x48] sm:$0xff]  ;;  %v79_v53 = vld [vmem:[%s3291_s9 + $0x30] sm:$0xff] }
 0xe43   :  { %v1740_v61 = vmul.f32 1.442695, %v1739_v60  ;;  %v78_v60 = vld [vmem:[%s3291_s9 + $0x28] sm:$0xff] }
 0xe44   :  { %v1748_v62 = vpop.permute.xlu0 %1747 }
 0xe45   :  { %2769 = vpow2.f32 %v1740_v61  ;;  %2647 = vmatpush3.msra.mxu1 %v1748_v62  ;;  %v77_v61 = vld [vmem:[%s3291_s9 + $0x20] sm:$0xff]  ;;  %v76_v62 = vld [vmem:[%s3291_s9 + $0x18] sm:$0xff] }
 0xe46   :  { %2656 = vmatprep.subr.mxu1 %v2803_v46 }
 0xe48   :  { %v1898_v7 = vpop.permute.xlu0 %1897 }
 0xe52   :  { %v2770_v63 = vpop.eup %2769 }
 0xe53   :  { %v1742_v2 = vsel %vm225_vm1, %v2770_v63, 0.0 }
 0xe54   :  { %1743 = vadd.xlane.f32.xlu1 %v1742_v2  ;;  %v74_v2 = vld [vmem:[%s3291_s9 + $0x8] sm:$0xff] }
 0xe65   :  { %1899 = vrot.lane.b32.xlu1 %v2970_v49, %s2812_s20 }
 0xedd   :  { %v1744_v3 = vpop.xlane.xlu1 %1743 }
 0xede   :  { %2771 = vrcp.f32 %v1744_v3  ;;  %v73_v3 = vld [vmem:[%s3291_s9] sm:$0xff] }
 0xee1   :  { %v1900_v6 = vpop.permute.xlu1 %1899 }
 0xeeb   :  { %v2772_v4 = vpop.eup %2771 }
 0xeec   :  { %v1746_v5 = vmul.f32 %v2772_v4, %v2770_v63  ;;  %v75_v63 = vld [vmem:[%s3291_s9 + $0x10] sm:$0xff]  ;;  %v97_v4 = vld [vmem:[%s3293_s11 + $0x38] sm:$0xff] }
 0xeee   :  { %2649 = vmatmul.mubr.msk.f32.vlgmr.msra.gmra.mxu1 %vm225_vm1, %v1746_v5  ;;  %v96_v5 = vld [vmem:[%s3293_s11 + $0x30] sm:$0xff] }
 0xeef   :  { %2657 = vmatpush3.xpose.msk.msra.mxu1 %vm225_vm1, %v1900_v6  ;;  %2658 = vmatprep.mubr.msk.f32.mxu1 %vm2804_vm0, %v2803_v46  ;;  %v95_v6 = vld [vmem:[%s3293_s11 + $0x28] sm:$0xff] }
 0xef0   :  { %2666 = vmatprep.subr.mxu1 %v2803_v46 }
 0xef2   :  { %2659 = vmatmul.mubr.msk.f32.vlgmr.msra.gmra.mxu1 %vm225_vm1, %v1898_v7  ;;  %v94_v7 = vld [vmem:[%s3293_s11 + $0x20] sm:$0xff] }
 0xef3   :  { %2667 = vmatpush3.msra.mxu1 %v3107_v28  ;;  %2668 = vmatprep.mubr.msk.f32.mxu1 %vm2804_vm0, %v2803_v46 }
 0xef4   :  { %2706 = vmatprep.subr.mxu1 %v97_v4 }
 0xfae   :  { %v1819_v8 = vpop.f32.mrf.mxu1 }
 0xfaf   :  { %2654 = vmatmul.mubr.msk.f32.vlgmr.msra.gmra.mxu0 %vm225_vm1, %v1819_v8 }
 0xfb0   :  { %v2650_v9 = vpop.f32.mrf.mxu1  ;;  %2663 = vmatprep.mubr.msk.f32.mxu0 %vm2804_vm0, %v2803_v46 }
 0xfb2   :  { %v1971_v11 = vpop.f32.mrf.mxu1 }
 0xfb3   :  { %v1975_v12 = vmul.f32 0.17677669, %v1971_v11 }
 0xfb4   :  { %v2660_v14 = vpop.f32.mrf.mxu1 }
 0xfb5   :  { %v1976_v15 = vsel %vm225_vm1, %v1975_v12, -inf }
 0xfb6   :  { %1977 = vmax.xlane.f32.xlu1 %v1976_v15 }
 0xfba   :  { %2147 = vadd.xlane.f32.xlu1 %v3167_v16 }
 0xfbe   :  { %2155 = vadd.xlane.f32.xlu1 %v2153_v17 }
0x103f   :  { %v1978_v46 = vpop.xlane.xlu1 %1977 }
0x1040   :  { %v1979_v18 = vsub.f32 %v1975_v12, %v1978_v46 }
0x1042   :  { %v1980_v19 = vmul.f32 1.442695, %v1979_v18 }
0x1043   :  { %v2148_v25 = vpop.xlane.xlu1 %2147 }
0x1044   :  { %2773 = vpow2.f32 %v1980_v19  ;;  %v2151_v27 = vmul.f32 0.03125, %v2148_v25 }
0x1046   :  { %v2161_v28 = vmul.f32 %v2151_v27, %v2151_v27  ;;  %v2165_v34 = vsub.f32 %v3167_v16, %v2151_v27 }
0x1047   :  { %v2156_v26 = vpop.xlane.xlu1 %2155 }
0x1048   :  { %v2159_v51 = vmul.f32 0.03125, %v2156_v26 }
0x104a   :  { %v2163_v29 = vsub.f32 %v2159_v51, %v2161_v28 }
0x104c   :  { %v2167_v30 = vadd.f32 1e-06, %v2163_v29 }
0x104e   :  { %2775 = vrsqrt.f32 %v2167_v30  ;;  %v2419_v30 = vld [vmem:[%s3294_s12] ss:$0 sm:$0xff] }
0x1051   :  { %v2774_v20 = vpop.eup %2773 }
0x1052   :  { %v1982_v21 = vsel %vm225_vm1, %v2774_v20, 0.0 }
0x1053   :  { %1983 = vadd.xlane.f32.xlu0 %v1982_v21  ;;  %v92_v21 = vld [vmem:[%s3293_s11 + $0x10] sm:$0xff] }
0x105b   :  { %v2776_v33 = vpop.eup %2775 }
0x105c   :  { %v2171_v35 = vmul.f32 %v2776_v33, %v2165_v34 }
0x1069   :  { %1987 = vrot.lane.b32.xlu0 %v2970_v49, %s2815_s3  ;;  %v3179_v49 = vld [vmem:[%s3289_s7] ss:$0 sm:$0xff] }
0x106a   :  { %v2179_v36 = vmul.f32 %v3179_v49, %v2171_v35 }
0x106c   :  { %v2187_v40 = vadd.f32 %v3185_v37, %v2179_v36 }
0x106f   :  { %v1892_v23 = vpop.f32.mrf.mxu0 }
0x1070   :  { %v1896_v0 = vadd.f32 %v1892_v23, %v1654_v54  ;;  %v86_v54 = vld [vmem:[%s3291_s9 + $0x68] sm:$0xff] }
0x1071   :  { %v2655_v24 = vpop.f32.mrf.mxu0  ;;  %v91_v23 = vld [vmem:[%s3293_s11 + $0x8] sm:$0xff] }
0x1072   :  { %v2418_v24 = vld [vmem:[%s3292_s10] ss:$0 sm:$0xff] }
0x10dc   :  { %v1984_v31 = vpop.xlane.xlu0 %1983 }
0x10dd   :  { %2777 = vrcp.f32 %v1984_v31 }
0x10e0   :  { %v1988_v32 = vpop.permute.xlu0 %1987 }
0x10e1   :  { %2662 = vmatpush3.msra.mxu0 %v1988_v32 }
0x10e2   :  { %2671 = vmatprep.subr.mxu0 %v88_v43 }
0x10ea   :  { %v2778_v38 = vpop.eup %2777 }
0x10eb   :  { %v1986_v39 = vmul.f32 %v2778_v38, %v2774_v20  ;;  %v93_v20 = vld [vmem:[%s3293_s11 + $0x18] sm:$0xff] }
0x10ed   :  { %2664 = vmatmul.mubr.msk.f32.vlgmr.msra.gmra.mxu0 %vm225_vm1, %v1986_v39 }
0x10ee   :  { %2703 = vmatprep.mubr.f32.mxu0 %v2187_v40  ;;  %2672 = vmatpush3.msra.mxu0 %v88_v43 }
0x10ef   :  { %2673 = vmatprep.subr.mxu0 %v87_v52 }
0x10f0   :  { %2674 = vmatpush3.msra.mxu0 %v87_v52 }
0x10f1   :  { %2675 = vmatprep.subr.mxu0 %v86_v54 }
0x10f2   :  { %2676 = vmatpush3.msra.mxu0 %v86_v54 }
0x11ad   :  { %v2059_v41 = vpop.f32.mrf.mxu0 }
0x11ae   :  { %2669 = vmatmul.mubr.msk.f32.vlgmr.msra.gmra.mxu1 %vm225_vm1, %v2059_v41 }
0x11af   :  { %v2665_v42 = vpop.f32.mrf.mxu0  ;;  %2707 = vmatpush3.msra.mxu1 %v97_v4 }
0x11b0   :  { %2708 = vmatprep.subr.mxu1 %v96_v5 }
0x11b1   :  { %2709 = vmatpush3.msra.mxu1 %v96_v5 }
0x11b2   :  { %2710 = vmatprep.subr.mxu1 %v95_v6 }
0x11b3   :  { %2711 = vmatpush3.msra.mxu1 %v95_v6 }
0x11b4   :  { %2712 = vmatprep.subr.mxu1 %v94_v7 }
0x11b5   :  { %2713 = vmatpush3.msra.mxu1 %v94_v7 }
0x11b6   :  { %2714 = vmatprep.subr.mxu1 %v93_v20 }
0x11b7   :  { %2715 = vmatpush3.msra.mxu1 %v93_v20 }
0x11b8   :  { %2716 = vmatprep.subr.mxu1 %v92_v21 }
0x11b9   :  { %2717 = vmatpush3.msra.mxu1 %v92_v21 }
0x11ba   :  { %2718 = vmatprep.subr.mxu1 %v91_v23 }
0x11bb   :  { %2719 = vmatpush3.msra.mxu1 %v91_v23 }
0x126e   :  { %v2132_v44 = vpop.f32.mrf.mxu1 }
0x126f   :  { %v2136_v45 = vadd.f32 %v2132_v44, %v1896_v0  ;;  %v90_v0 = vld [vmem:[%s3293_s11] sm:$0xff]  ;;  %s2816_s11 = smov [#allocation2]  }
0x1270   :  { %v2670_v22 = vpop.f32.mrf.mxu1  ;;  %2720 = vmatprep.subr.mxu1 %v90_v0  ;;  %s2369_s28 = sshll.u32 %s2816_s11, 4  ;;  %s2370_s28 = int_to_ptr.vmem [resolvable:$true] %s2369_s28 }
0x1271   :  { %v2144_v47 = vadd.f32 %v2415_v10, %v2136_v45  ;;  %2721 = vmatpush3.msra.mxu1 %v90_v0  ;;  %s2781_s10 = scalar_lea.vmem %s2370_s28, 256  ;;  %p2786_p1 = scmp.lt.s32.totalorder %s2370_s28, %s2370_s28 }
0x1272   :  { %p2782_p0 = scmp.ne.s32.totalorder %s2370_s28, %s2781_s10  ;;  %p2787_p2 = scmp.lt.s32.totalorder %s2781_s10, %s2781_s10 }
0x1273   :  { %v3194_v48 = vadd.f32 %v2144_v47, %v2897_v1  ;;  %v85_v1 = vld [vmem:[%s3291_s9 + $0x60] sm:$0xff] }
0x1274   :  { %2677 = vmatprep.subr.mxu0 %v85_v1  ;;  %p2788_p3 = por %p2787_p2, %p2786_p1 }
0x1275   :  { %2149 = vadd.xlane.f32.xlu1 %v3194_v48  ;;  %v2154_v50 = vmul.f32 %v3194_v48, %v3194_v48  ;;  %2678 = vmatpush3.msra.mxu0 %v85_v1 }
0x1276   :  { %2679 = vmatprep.subr.mxu0 %v84_v55  ;;  %p2789_p4 = pnand %p2788_p3, %p2782_p0 }
0x1277   :  { %2680 = vmatpush3.msra.mxu0 %v84_v55 }
0x1278   :  { %2681 = vmatprep.subr.mxu0 %v83_v56 }
0x1279   :  { %2157 = vadd.xlane.f32.xlu1 %v2154_v50  ;;  %2682 = vmatpush3.msra.mxu0 %v83_v56 }
0x127a   :  { %2683 = vmatprep.subr.mxu0 %v82_v57 }
0x127b   :  { %2684 = vmatpush3.msra.mxu0 %v82_v57 }
0x127c   :  { %2685 = vmatprep.subr.mxu0 %v81_v58 }
0x127d   :  { %2686 = vmatpush3.msra.mxu0 %v81_v58 }
0x127e   :  { %2687 = vmatprep.subr.mxu0 %v80_v59 }
0x127f   :  { %2688 = vmatpush3.msra.mxu0 %v80_v59 }
0x1280   :  { %2689 = vmatprep.subr.mxu0 %v79_v53 }
0x1281   :  { %2690 = vmatpush3.msra.mxu0 %v79_v53 }
0x1282   :  { %2691 = vmatprep.subr.mxu0 %v78_v60 }
0x1283   :  { %2692 = vmatpush3.msra.mxu0 %v78_v60 }
0x1284   :  { %2693 = vmatprep.subr.mxu0 %v77_v61 }
0x1285   :  { %2694 = vmatpush3.msra.mxu0 %v77_v61 }
0x1286   :  { %2695 = vmatprep.subr.mxu0 %v76_v62 }
0x1287   :  { %2696 = vmatpush3.msra.mxu0 %v76_v62 }
0x1288   :  { %2697 = vmatprep.subr.mxu0 %v75_v63 }
0x1289   :  { %2698 = vmatpush3.msra.mxu0 %v75_v63 }
0x128a   :  { %2699 = vmatprep.subr.mxu0 %v74_v2 }
0x128b   :  { %2700 = vmatpush3.msra.mxu0 %v74_v2 }
0x128c   :  { %2701 = vmatprep.subr.mxu0 %v73_v3 }
0x128d   :  { %2702 = vmatpush3.msra.mxu0 %v73_v3 }
0x12fe   :  { %v2150_v8 = vpop.xlane.xlu1 %2149 }
0x12ff   :  { %v2152_v9 = vmul.f32 0.03125, %v2150_v8 }
0x1301   :  { %v2162_v11 = vmul.f32 %v2152_v9, %v2152_v9  ;;  %v2166_v15 = vsub.f32 %v3194_v48, %v2152_v9 }
0x1302   :  { %v2158_v10 = vpop.xlane.xlu1 %2157 }
0x1303   :  { %v2160_v12 = vmul.f32 0.03125, %v2158_v10 }
0x1305   :  { %v2164_v13 = vsub.f32 %v2160_v12, %v2162_v11 }
0x1307   :  { %v2168_v14 = vadd.f32 1e-06, %v2164_v13 }
0x1309   :  { %2779 = vrsqrt.f32 %v2168_v14 }
0x1316   :  { %v2780_v17 = vpop.eup %2779 }
0x1317   :  { %v2172_v46 = vmul.f32 %v2780_v17, %v2166_v15 }
0x1319   :  { %v2180_v18 = vmul.f32 %v3179_v49, %v2172_v46 }
0x131b   :  { %v2188_v19 = vadd.f32 %v3185_v37, %v2180_v18 }
0x131d   :  { %2704 = vmatmul.mubr.f32.vlgmr.msra.gmra.mxu0 %v2188_v19 }
0x13dd   :  { %v2705_v25 = vpop.f32.mrf.mxu0 }
0x13de   :  { %v2267_v26 = vadd.f32 %v2705_v25, %v2418_v24 }
0x13df   :  { %v2261_v27 = vpop.f32.mrf.mxu0 }
0x13e0   :  { %v2262_v51 = vadd.f32 %v2418_v24, %v2261_v27  ;;  %v2271_v29 = vmax.f32 %v2267_v26, 0.0 }
0x13e2   :  { %v2270_v28 = vmax.f32 %v2262_v51, 0.0 }
0x13e4   :  { %2722 = vmatprep.mubr.msk.f32.mxu1 %vm2278_vm2, %v2270_v28 }
0x13e5   :  { %2723 = vmatmul.mubr.msk.f32.vlgmr.msra.gmra.mxu1 %vm2278_vm2, %v2271_v29 }
0x14a5   :  { %v2724_v31 = vpop.f32.mrf.mxu1 }
0x14a6   :  { %v2357_v32 = vadd.f32 %v2724_v31, %v2419_v30 }
0x14a7   :  { %v2351_v33 = vpop.f32.mrf.mxu1 }
0x14a8   :  { %v2361_v34 = vadd.f32 %v2357_v32, %v3194_v48  ;;  %v2352_v35 = vadd.f32 %v2419_v30, %v2351_v33 }
0x14aa   :  { %2363 = vst [vmem:[#allocation2 + $0x8] sm:$0xff] %v2361_v34  ;;  %v2360_v49 = vadd.f32 %v2352_v35, %v3167_v16 }
0x14ac   :  { %2362 = vst [vmem:[#allocation2] sm:$0xff] %v2360_v49 }
0x14ad   :  { %2792 = shalt.err (!%p2789_p4)
}
0x14ae   :  { %s2817_s12 = smov 128   ;;  %s2818_s7 = smov 8  }
0x14af   :  { %2375 = dma.vmem_to_hbm [thread:$0]  %s2370_s28, 256, %s3295_s13, [#allocation3], %s2817_s12, %s2817_s12, %s2818_s7  }
0x14b0   :  { %2801 = dma.done.wait [#allocation3], 256  }
0x14b1   :  { %2802 = vsyncadd [#allocation3], 4294967040 }
0x14b2   :  { %2379 = vsyncpa [#allocation3], 1 }

</bundles_post_ra>
